<compile_context>
chip_gen: v7x
topology: tpu7x:2x2x1
jax: 0.10.0
libtpu: 0.0.40
codegen_flags: <defaults>
</compile_context>

<pallas_src>
import functools

import jax
import jax.numpy as jnp
from jax.experimental import pallas as pl
from jax.experimental.pallas import tpu as pltpu


# ----------------------------------------------------------------------------
# Fused whole-model kernel.
# ----------------------------------------------------------------------------
def _model_kernel(*refs, T, Bp, H, L):
    cap_ref, emb_ref = refs[0], refs[1]
    lstm_refs = refs[2:2 + 3 * L]
    w1_ref, b1_ref, w2_ref, b2_ref = refs[2 + 3 * L:6 + 3 * L]
    o_ref = refs[6 + 3 * L]
    y_ref = refs[7 + 3 * L]                                  # VMEM scratch (T*Bp, 2H) f32

    Vp = emb_ref.shape[0]
    TB = T * Bp
    G8 = 8 * H

    # ---- fused embedding lookup: one-hot (TB, Vp) @ table (Vp, E) on the MXU ----
    ids = cap_ref[...]                                       # (TB, 1) int32, time-major
    iota_v = jax.lax.broadcasted_iota(jnp.int32, (TB, Vp), 1)
    onehot = (ids == iota_v).astype(jnp.bfloat16)
    x_bf = jnp.dot(onehot, emb_ref[...],
                   preferred_element_type=jnp.float32).astype(jnp.bfloat16)  # (TB, E)

    # Forward-direction columns of the merged [i_f|i_b|f_f|f_b|o_f|o_b|g_f|g_b] layout.
    lane = jax.lax.broadcasted_iota(jnp.int32, (Bp, G8), 1)
    fwd_mask = (lane % (2 * H)) < H                          # (Bp, 8H) bool

    h_f_last = None
    h_b_last = None
    for l in range(L):
        wih_ref, u_ref, b_ref = lstm_refs[3 * l:3 * l + 3]
        U = u_ref[...]                                       # (2H, 8H) bf16, hoisted
        is_last = (l == L - 1)

        # Hoisted input projection: all timesteps, both directions, one dot + bias.
        g_all = jnp.dot(x_bf, wih_ref[...],
                        preferred_element_type=jnp.float32) + b_ref[...]     # (TB, 8H)

        h = jnp.zeros((Bp, 2 * H), jnp.float32)
        c = jnp.zeros((Bp, 2 * H), jnp.float32)
        for t in range(T):
            tb = T - 1 - t
            g_fwd = g_all[t * Bp:(t + 1) * Bp]
            if tb == t:
                g_step = g_fwd
            else:
                # forward half sees x[t], backward half sees x[T-1-t]
                g_step = jnp.where(fwd_mask, g_fwd, g_all[tb * Bp:(tb + 1) * Bp])

            if t == 0:
                gates = g_step                               # h == c == 0
            else:
                gates = g_step + jnp.dot(h.astype(jnp.bfloat16), U,
                                         preferred_element_type=jnp.float32)

            s = jax.nn.sigmoid(gates[:, 0:6 * H])            # [i_f|i_b|f_f|f_b|o_f|o_b]
            g_act = jnp.tanh(gates[:, 6 * H:8 * H])          # [g_f|g_b]
            i_g = s[:, 0:2 * H]
            f_g = s[:, 2 * H:4 * H]
            o_g = s[:, 4 * H:6 * H]
            c = i_g * g_act if t == 0 else f_g * c + i_g * g_act
            h = o_g * jnp.tanh(c)

            if is_last:
                # Head consumes hiddens[:, -1, :] only: backward half = state right
                # after its FIRST merged step (it sees x[T-1] first); forward half =
                # state after the last step.
                if t == 0:
                    h_b_last = h[:, H:2 * H]
                if t == T - 1:
                    h_f_last = h[:, 0:H]
            else:
                y_ref[t * Bp:(t + 1) * Bp, 0:H] = h[:, 0:H]
                y_ref[tb * Bp:(tb + 1) * Bp, H:2 * H] = h[:, H:2 * H]

        if not is_last:
            x_bf = y_ref[...].astype(jnp.bfloat16)           # (TB, 2H) next-layer input

    # ---- head: ReLU([h_f, h_b] @ W1 + b1) @ W2 + b2 (concat via split matmul) ----
    hdn = (jnp.dot(h_f_last.astype(jnp.bfloat16), w1_ref[0:H, :],
                   preferred_element_type=jnp.float32)
           + jnp.dot(h_b_last.astype(jnp.bfloat16), w1_ref[H:2 * H, :],
                     preferred_element_type=jnp.float32)
           + b1_ref[...])
    hdn = jnp.maximum(hdn, 0.0)
    out = jnp.dot(hdn.astype(jnp.bfloat16), w2_ref[...],
                  preferred_element_type=jnp.float32) + b2_ref[...]
    o_ref[...] = out                                         # full (Bp, 128) store


# ----------------------------------------------------------------------------
# Wrapper: weight permutation / padding + fused kernel call.
# ----------------------------------------------------------------------------
def _merge_cols(a_f, a_b, H):
    """(d,4H)+(d,4H), PyTorch gate order [i,f,g,o] per direction ->
    (d,8H) merged layout [i_f|i_b|f_f|f_b|o_f|o_b|g_f|g_b]."""
    parts = []
    for blk in (0, 1, 3, 2):      # i, f, o, g  (sigmoid block first, tanh block last)
        parts.append(a_f[:, blk * H:(blk + 1) * H])
        parts.append(a_b[:, blk * H:(blk + 1) * H])
    return jnp.concatenate(parts, axis=1)


def _model_forward_impl(params, captions):
    B, T = captions.shape
    H = params["lstm"][0][0][1].shape[0]
    L = len(params["lstm"])
    E = params["embed"].shape[1]
    V = params["embed"].shape[0]
    OD = params["w2"].shape[1]

    Bp = ((B + 7) // 8) * 8            # sublane-padded batch
    Vp = ((V + 127) // 128) * 128      # lane-padded vocab for the one-hot matmul
    ODp = ((OD + 127) // 128) * 128    # lane-padded head output

    # Time-major, sublane-padded ids (pad rows use id 0; sliced away at the end).
    cap = jnp.zeros((T, Bp), jnp.int32).at[:, :B].set(
        jnp.transpose(captions).astype(jnp.int32)).reshape(T * Bp, 1)

    emb_p = jnp.zeros((Vp, E), jnp.float32).at[:V].set(
        params["embed"]).astype(jnp.bfloat16)

    inputs = [cap, emb_p]
    for (p_f, p_b) in params["lstm"]:
        w_ih_f, w_hh_f, b_f = p_f
        w_ih_b, w_hh_b, b_b = p_b
        wih = _merge_cols(w_ih_f, w_ih_b, H).astype(jnp.bfloat16)       # (d_in, 8H)
        # Block-"diagonal" recurrence matrix in the merged column layout.
        whh = jnp.concatenate(
            [_merge_cols(w_hh_f, jnp.zeros_like(w_hh_f), H),
             _merge_cols(jnp.zeros_like(w_hh_b), w_hh_b, H)],
            axis=0).astype(jnp.bfloat16)                                 # (2H, 8H)
        bias = _merge_cols(b_f, b_b, H)                                  # (1, 8H) f32
        inputs += [wih, whh, bias]

    w1 = params["w1"].astype(jnp.bfloat16)
    b1 = params["b1"]
    w2p = jnp.zeros((params["w2"].shape[0], ODp), jnp.float32).at[:, :OD].set(
        params["w2"]).astype(jnp.bfloat16)
    b2p = jnp.zeros((1, ODp), jnp.float32).at[:, :OD].set(params["b2"])
    inputs += [w1, b1, w2p, b2p]

    kernel = functools.partial(_model_kernel, T=T, Bp=Bp, H=H, L=L)
    out = pl.pallas_call(
        kernel,
        out_shape=jax.ShapeDtypeStruct((Bp, ODp), jnp.float32),
        in_specs=[pl.BlockSpec(memory_space=pltpu.MemorySpace.VMEM)] * len(inputs),
        out_specs=pl.BlockSpec(memory_space=pltpu.MemorySpace.VMEM),
        scratch_shapes=[pltpu.VMEM((T * Bp, 2 * H), jnp.float32)],
    )(*inputs)
    return out[:B, :OD]


model_forward = jax.jit(_model_forward_impl)


# ----------------------------------------------------------------------------
# Parameter init (PyTorch-style distributions / layout).
# ----------------------------------------------------------------------------
def init_params(key, embed_size, hidden_size, vocab_size, num_layers):
    keys = iter(jax.random.split(key, 64))
    params = {}
    params["embed"] = jax.random.normal(next(keys), (vocab_size, embed_size), jnp.float32)

    k = 1.0 / jnp.sqrt(hidden_size)
    lstm = []
    for layer in range(num_layers):
        d_in = embed_size if layer == 0 else 2 * hidden_size
        dirs = []
        for _ in range(2):  # forward, backward
            w_ih = jax.random.uniform(next(keys), (d_in, 4 * hidden_size), jnp.float32, -k, k)
            w_hh = jax.random.uniform(next(keys), (hidden_size, 4 * hidden_size), jnp.float32, -k, k)
            b_ih = jax.random.uniform(next(keys), (1, 4 * hidden_size), jnp.float32, -k, k)
            b_hh = jax.random.uniform(next(keys), (1, 4 * hidden_size), jnp.float32, -k, k)
            dirs.append((w_ih, w_hh, b_ih + b_hh))
        lstm.append(tuple(dirs))
    params["lstm"] = lstm

    k1 = 1.0 / jnp.sqrt(2 * hidden_size)
    params["w1"] = jax.random.uniform(next(keys), (2 * hidden_size, 256), jnp.float32, -k1, k1)
    params["b1"] = jax.random.uniform(next(keys), (1, 256), jnp.float32, -k1, k1)
    k2 = 1.0 / jnp.sqrt(256)
    params["w2"] = jax.random.uniform(next(keys), (256, 19), jnp.float32, -k2, k2)
    params["b2"] = jax.random.uniform(next(keys), (1, 19), jnp.float32, -k2, k2)
    return params


# ----------------------------------------------------------------------------
# Pure-JAX f32 reference (numerical sanity check).
# ----------------------------------------------------------------------------
def _reference_forward(params, captions):
    H = params["lstm"][0][0][1].shape[0]
    emb = jnp.take(params["embed"], captions, axis=0)        # (B, T, E)
    x = jnp.transpose(emb, (1, 0, 2))                        # (T, B, E)

    def run_dir(x_seq, w_ih, w_hh, b):
        Bn = x_seq.shape[1]

        def step(carry, x_t):
            h, c = carry
            gates = x_t @ w_ih + h @ w_hh + b
            i = jax.nn.sigmoid(gates[:, :H])
            f = jax.nn.sigmoid(gates[:, H:2 * H])
            g = jnp.tanh(gates[:, 2 * H:3 * H])
            o = jax.nn.sigmoid(gates[:, 3 * H:4 * H])
            c = f * c + i * g
            h = o * jnp.tanh(c)
            return (h, c), h

        init = (jnp.zeros((Bn, H), jnp.float32), jnp.zeros((Bn, H), jnp.float32))
        _, hs = jax.lax.scan(step, init, x_seq)
        return hs                                            # (T, B, H)

    h = x
    for p_fwd, p_bwd in params["lstm"]:
        hf = run_dir(h, *p_fwd)
        hb = jnp.flip(run_dir(jnp.flip(h, 0), *p_bwd), 0)
        h = jnp.concatenate([hf, hb], axis=-1)
    last = h[-1]
    z = jnp.maximum(last @ params["w1"] + params["b1"], 0.0)
    return z @ params["w2"] + params["b2"]


if __name__ == "__main__":
    embed_size, hidden_size, vocab_size, num_layers = 32, 32, 50, 2
    batch, seq = 2, 8

    key = jax.random.PRNGKey(0)
    pkey, dkey = jax.random.split(key)
    params = init_params(pkey, embed_size, hidden_size, vocab_size, num_layers)
    captions = jax.random.randint(dkey, (batch, seq), 0, vocab_size, dtype=jnp.int32)

    out = model_forward(params, captions)
    jax.block_until_ready(out)

    assert out.shape == (batch, 19) and out.dtype == jnp.float32
    assert bool(jnp.all(jnp.isfinite(out)))
    ref = _reference_forward(params, captions)
    # bf16 MXU operands (f32 accumulation / f32 elementwise): slightly looser tolerance.
    assert float(jnp.max(jnp.abs(out - ref))) < 3e-2
    print("KERNEL_OK")
</pallas_src>

<mosaic_0001>
module attributes {stable_mosaic.version = 11 : i64} {
  func.func @_model_kernel(%arg0: memref<64x1xi32, #tpu.memory_space<vmem>>, %arg1: memref<128x32xbf16, #tpu.memory_space<vmem>>, %arg2: memref<32x256xbf16, #tpu.memory_space<vmem>>, %arg3: memref<64x256xbf16, #tpu.memory_space<vmem>>, %arg4: memref<1x256xf32, #tpu.memory_space<vmem>>, %arg5: memref<64x256xbf16, #tpu.memory_space<vmem>>, %arg6: memref<64x256xbf16, #tpu.memory_space<vmem>>, %arg7: memref<1x256xf32, #tpu.memory_space<vmem>>, %arg8: memref<64x256xbf16, #tpu.memory_space<vmem>>, %arg9: memref<1x256xf32, #tpu.memory_space<vmem>>, %arg10: memref<256x128xbf16, #tpu.memory_space<vmem>>, %arg11: memref<1x128xf32, #tpu.memory_space<vmem>>, %arg12: memref<8x128xf32, #tpu.memory_space<vmem>>, %arg13: memref<64x64xf32, #tpu.memory_space<vmem>>) attributes {dimension_semantics = [], scalar_prefetch = 0 : i64, scratch_operands = 1 : i64, tpu.core_type = #tpu.core_type<tc>} {
    %c0 = arith.constant 0 : index
    %c0_0 = arith.constant 0 : index
    %0 = vector.load %arg0[%c0, %c0_0] : memref<64x1xi32, #tpu.memory_space<vmem>>, vector<64x1xi32>
    %1 = tpu.iota {dimensions = array<i32: 1>} : vector<64x128xi32>
    %2 = vector.broadcast %0 : vector<64x1xi32> to vector<64x128xi32>
    %3 = arith.cmpi eq, %2, %1 : vector<64x128xi32>
    %4 = arith.extui %3 : vector<64x128xi1> to vector<64x128xi32>
    %5 = arith.sitofp %4 : vector<64x128xi32> to vector<64x128xf32>
    %6 = arith.truncf %5 : vector<64x128xf32> to vector<64x128xbf16>
    %c0_1 = arith.constant 0 : index
    %c0_2 = arith.constant 0 : index
    %7 = vector.load %arg1[%c0_1, %c0_2] : memref<128x32xbf16, #tpu.memory_space<vmem>>, vector<128x32xbf16>
    %cst = arith.constant dense<0.000000e+00> : vector<64x32xf32>
    %8 = tpu.matmul %6, %7, %cst {dimension_numbers = #tpu.dot_dimension_numbers<[1], [0], [0], [1], [0, 0, 1, 1], [], []>} : vector<64x128xbf16>, vector<128x32xbf16>, vector<64x32xf32> -> vector<64x32xf32>
    %9 = arith.truncf %8 : vector<64x32xf32> to vector<64x32xbf16>
    %10 = tpu.iota {dimensions = array<i32: 1>} : vector<8x256xi32>
    %c64_i32 = arith.constant 64 : i32
    %c0_i32 = arith.constant 0 : i32
    %11 = arith.cmpi eq, %c64_i32, %c0_i32 : i32
    %c1_i32 = arith.constant 1 : i32
    %12 = arith.select %11, %c1_i32, %c64_i32 : i32
    %13 = vector.broadcast %12 : i32 to vector<8x256xi32>
    %14 = arith.remsi %10, %13 : vector<8x256xi32>
    %c0_i32_3 = arith.constant 0 : i32
    %15 = vector.broadcast %c0_i32_3 : i32 to vector<8x256xi32>
    %16 = arith.cmpi ne, %14, %15 : vector<8x256xi32>
    %c0_i32_4 = arith.constant 0 : i32
    %17 = vector.broadcast %c0_i32_4 : i32 to vector<8x256xi32>
    %18 = arith.cmpi slt, %14, %17 : vector<8x256xi32>
    %c0_i32_5 = arith.constant 0 : i32
    %19 = arith.cmpi slt, %12, %c0_i32_5 : i32
    %20 = vector.broadcast %19 : i1 to vector<8x256xi1>
    %21 = vector.broadcast %20 : vector<8x256xi1> to vector<8x256xi1>
    %22 = arith.xori %18, %21 : vector<8x256xi1>
    %23 = arith.andi %22, %16 : vector<8x256xi1>
    %24 = vector.broadcast %12 : i32 to vector<8x256xi32>
    %25 = arith.addi %14, %24 : vector<8x256xi32>
    %26 = arith.select %23, %25, %14 : vector<8x256xi1>, vector<8x256xi32>
    %c32_i32 = arith.constant 32 : i32
    %27 = vector.broadcast %c32_i32 : i32 to vector<8x256xi32>
    %28 = arith.cmpi slt, %26, %27 : vector<8x256xi32>
    %c0_6 = arith.constant 0 : index
    %c0_7 = arith.constant 0 : index
    %29 = vector.load %arg3[%c0_6, %c0_7] : memref<64x256xbf16, #tpu.memory_space<vmem>>, vector<64x256xbf16>
    %c0_8 = arith.constant 0 : index
    %c0_9 = arith.constant 0 : index
    %30 = vector.load %arg2[%c0_8, %c0_9] : memref<32x256xbf16, #tpu.memory_space<vmem>>, vector<32x256xbf16>
    %cst_10 = arith.constant dense<0.000000e+00> : vector<64x256xf32>
    %31 = tpu.matmul %9, %30, %cst_10 {dimension_numbers = #tpu.dot_dimension_numbers<[1], [0], [0], [1], [0, 0, 1, 1], [], []>} : vector<64x32xbf16>, vector<32x256xbf16>, vector<64x256xf32> -> vector<64x256xf32>
    %c0_11 = arith.constant 0 : index
    %c0_12 = arith.constant 0 : index
    %32 = vector.load %arg4[%c0_11, %c0_12] : memref<1x256xf32, #tpu.memory_space<vmem>>, vector<1x256xf32>
    %33 = vector.broadcast %32 : vector<1x256xf32> to vector<64x256xf32>
    %34 = arith.addf %31, %33 : vector<64x256xf32>
    %35 = vector.extract_strided_slice %34 {offsets = [0, 0], sizes = [8, 256], strides = [1, 1]} : vector<64x256xf32> to vector<8x256xf32>
    %36 = vector.extract_strided_slice %34 {offsets = [56, 0], sizes = [8, 256], strides = [1, 1]} : vector<64x256xf32> to vector<8x256xf32>
    %37 = arith.select %28, %35, %36 : vector<8x256xi1>, vector<8x256xf32>
    %38 = vector.extract_strided_slice %37 {offsets = [0, 0], sizes = [8, 192], strides = [1, 1]} : vector<8x256xf32> to vector<8x192xf32>
    %39 = arith.negf %38 : vector<8x192xf32>
    %40 = math.exp %39 : vector<8x192xf32>
    %cst_13 = arith.constant 1.000000e+00 : f32
    %41 = vector.broadcast %cst_13 : f32 to vector<8x192xf32>
    %42 = arith.addf %41, %40 : vector<8x192xf32>
    %43 = arith.divf %41, %42 : vector<8x192xf32>
    %44 = vector.extract_strided_slice %37 {offsets = [0, 192], sizes = [8, 64], strides = [1, 1]} : vector<8x256xf32> to vector<8x64xf32>
    %45 = math.tanh %44 : vector<8x64xf32>
    %46 = vector.extract_strided_slice %43 {offsets = [0, 0], sizes = [8, 64], strides = [1, 1]} : vector<8x192xf32> to vector<8x64xf32>
    %47 = vector.extract_strided_slice %43 {offsets = [0, 128], sizes = [8, 64], strides = [1, 1]} : vector<8x192xf32> to vector<8x64xf32>
    %48 = arith.mulf %46, %45 : vector<8x64xf32>
    %49 = math.tanh %48 : vector<8x64xf32>
    %50 = arith.mulf %47, %49 : vector<8x64xf32>
    %51 = vector.extract_strided_slice %50 {offsets = [0, 0], sizes = [8, 32], strides = [1, 1]} : vector<8x64xf32> to vector<8x32xf32>
    %c0_14 = arith.constant 0 : index
    %c0_15 = arith.constant 0 : index
    %52 = vector.load %arg13[%c0_14, %c0_15] : memref<64x64xf32, #tpu.memory_space<vmem>>, vector<8x32xf32>
    tpu.vector_store %arg13[%c0_14, %c0_15], %51 {strides = array<i32>} : memref<64x64xf32, #tpu.memory_space<vmem>>, vector<8x32xf32>,
    %53 = vector.extract_strided_slice %50 {offsets = [0, 32], sizes = [8, 32], strides = [1, 1]} : vector<8x64xf32> to vector<8x32xf32>
    %c56 = arith.constant 56 : index
    %c32 = arith.constant 32 : index
    %54 = vector.load %arg13[%c56, %c32] : memref<64x64xf32, #tpu.memory_space<vmem>>, vector<8x32xf32>
    tpu.vector_store %arg13[%c56, %c32], %53 {strides = array<i32>} : memref<64x64xf32, #tpu.memory_space<vmem>>, vector<8x32xf32>,
    %55 = vector.extract_strided_slice %34 {offsets = [8, 0], sizes = [8, 256], strides = [1, 1]} : vector<64x256xf32> to vector<8x256xf32>
    %56 = vector.extract_strided_slice %34 {offsets = [48, 0], sizes = [8, 256], strides = [1, 1]} : vector<64x256xf32> to vector<8x256xf32>
    %57 = arith.select %28, %55, %56 : vector<8x256xi1>, vector<8x256xf32>
    %58 = arith.truncf %50 : vector<8x64xf32> to vector<8x64xbf16>
    %cst_16 = arith.constant dense<0.000000e+00> : vector<8x256xf32>
    %59 = tpu.matmul %58, %29, %cst_16 {dimension_numbers = #tpu.dot_dimension_numbers<[1], [0], [0], [1], [0, 0, 1, 1], [], []>} : vector<8x64xbf16>, vector<64x256xbf16>, vector<8x256xf32> -> vector<8x256xf32>
    %60 = arith.addf %57, %59 : vector<8x256xf32>
    %61 = vector.extract_strided_slice %60 {offsets = [0, 0], sizes = [8, 192], strides = [1, 1]} : vector<8x256xf32> to vector<8x192xf32>
    %62 = arith.negf %61 : vector<8x192xf32>
    %63 = math.exp %62 : vector<8x192xf32>
    %cst_17 = arith.constant 1.000000e+00 : f32
    %64 = vector.broadcast %cst_17 : f32 to vector<8x192xf32>
    %65 = arith.addf %64, %63 : vector<8x192xf32>
    %66 = arith.divf %64, %65 : vector<8x192xf32>
    %67 = vector.extract_strided_slice %60 {offsets = [0, 192], sizes = [8, 64], strides = [1, 1]} : vector<8x256xf32> to vector<8x64xf32>
    %68 = math.tanh %67 : vector<8x64xf32>
    %69 = vector.extract_strided_slice %66 {offsets = [0, 0], sizes = [8, 64], strides = [1, 1]} : vector<8x192xf32> to vector<8x64xf32>
    %70 = vector.extract_strided_slice %66 {offsets = [0, 64], sizes = [8, 64], strides = [1, 1]} : vector<8x192xf32> to vector<8x64xf32>
    %71 = vector.extract_strided_slice %66 {offsets = [0, 128], sizes = [8, 64], strides = [1, 1]} : vector<8x192xf32> to vector<8x64xf32>
    %72 = arith.mulf %70, %48 : vector<8x64xf32>
    %73 = arith.mulf %69, %68 : vector<8x64xf32>
    %74 = arith.addf %72, %73 : vector<8x64xf32>
    %75 = math.tanh %74 : vector<8x64xf32>
    %76 = arith.mulf %71, %75 : vector<8x64xf32>
    %77 = vector.extract_strided_slice %76 {offsets = [0, 0], sizes = [8, 32], strides = [1, 1]} : vector<8x64xf32> to vector<8x32xf32>
    %c8 = arith.constant 8 : index
    %c0_18 = arith.constant 0 : index
    %78 = vector.load %arg13[%c8, %c0_18] : memref<64x64xf32, #tpu.memory_space<vmem>>, vector<8x32xf32>
    tpu.vector_store %arg13[%c8, %c0_18], %77 {strides = array<i32>} : memref<64x64xf32, #tpu.memory_space<vmem>>, vector<8x32xf32>,
    %79 = vector.extract_strided_slice %76 {offsets = [0, 32], sizes = [8, 32], strides = [1, 1]} : vector<8x64xf32> to vector<8x32xf32>
    %c48 = arith.constant 48 : index
    %c32_19 = arith.constant 32 : index
    %80 = vector.load %arg13[%c48, %c32_19] : memref<64x64xf32, #tpu.memory_space<vmem>>, vector<8x32xf32>
    tpu.vector_store %arg13[%c48, %c32_19], %79 {strides = array<i32>} : memref<64x64xf32, #tpu.memory_space<vmem>>, vector<8x32xf32>,
    %81 = vector.extract_strided_slice %34 {offsets = [16, 0], sizes = [8, 256], strides = [1, 1]} : vector<64x256xf32> to vector<8x256xf32>
    %82 = vector.extract_strided_slice %34 {offsets = [40, 0], sizes = [8, 256], strides = [1, 1]} : vector<64x256xf32> to vector<8x256xf32>
    %83 = arith.select %28, %81, %82 : vector<8x256xi1>, vector<8x256xf32>
    %84 = arith.truncf %76 : vector<8x64xf32> to vector<8x64xbf16>
    %cst_20 = arith.constant dense<0.000000e+00> : vector<8x256xf32>
    %85 = tpu.matmul %84, %29, %cst_20 {dimension_numbers = #tpu.dot_dimension_numbers<[1], [0], [0], [1], [0, 0, 1, 1], [], []>} : vector<8x64xbf16>, vector<64x256xbf16>, vector<8x256xf32> -> vector<8x256xf32>
    %86 = arith.addf %83, %85 : vector<8x256xf32>
    %87 = vector.extract_strided_slice %86 {offsets = [0, 0], sizes = [8, 192], strides = [1, 1]} : vector<8x256xf32> to vector<8x192xf32>
    %88 = arith.negf %87 : vector<8x192xf32>
    %89 = math.exp %88 : vector<8x192xf32>
    %cst_21 = arith.constant 1.000000e+00 : f32
    %90 = vector.broadcast %cst_21 : f32 to vector<8x192xf32>
    %91 = arith.addf %90, %89 : vector<8x192xf32>
    %92 = arith.divf %90, %91 : vector<8x192xf32>
    %93 = vector.extract_strided_slice %86 {offsets = [0, 192], sizes = [8, 64], strides = [1, 1]} : vector<8x256xf32> to vector<8x64xf32>
    %94 = math.tanh %93 : vector<8x64xf32>
    %95 = vector.extract_strided_slice %92 {offsets = [0, 0], sizes = [8, 64], strides = [1, 1]} : vector<8x192xf32> to vector<8x64xf32>
    %96 = vector.extract_strided_slice %92 {offsets = [0, 64], sizes = [8, 64], strides = [1, 1]} : vector<8x192xf32> to vector<8x64xf32>
    %97 = vector.extract_strided_slice %92 {offsets = [0, 128], sizes = [8, 64], strides = [1, 1]} : vector<8x192xf32> to vector<8x64xf32>
    %98 = arith.mulf %96, %74 : vector<8x64xf32>
    %99 = arith.mulf %95, %94 : vector<8x64xf32>
    %100 = arith.addf %98, %99 : vector<8x64xf32>
    %101 = math.tanh %100 : vector<8x64xf32>
    %102 = arith.mulf %97, %101 : vector<8x64xf32>
    %103 = vector.extract_strided_slice %102 {offsets = [0, 0], sizes = [8, 32], strides = [1, 1]} : vector<8x64xf32> to vector<8x32xf32>
    %c16 = arith.constant 16 : index
    %c0_22 = arith.constant 0 : index
    %104 = vector.load %arg13[%c16, %c0_22] : memref<64x64xf32, #tpu.memory_space<vmem>>, vector<8x32xf32>
    tpu.vector_store %arg13[%c16, %c0_22], %103 {strides = array<i32>} : memref<64x64xf32, #tpu.memory_space<vmem>>, vector<8x32xf32>,
    %105 = vector.extract_strided_slice %102 {offsets = [0, 32], sizes = [8, 32], strides = [1, 1]} : vector<8x64xf32> to vector<8x32xf32>
    %c40 = arith.constant 40 : index
    %c32_23 = arith.constant 32 : index
    %106 = vector.load %arg13[%c40, %c32_23] : memref<64x64xf32, #tpu.memory_space<vmem>>, vector<8x32xf32>
    tpu.vector_store %arg13[%c40, %c32_23], %105 {strides = array<i32>} : memref<64x64xf32, #tpu.memory_space<vmem>>, vector<8x32xf32>,
    %107 = vector.extract_strided_slice %34 {offsets = [24, 0], sizes = [8, 256], strides = [1, 1]} : vector<64x256xf32> to vector<8x256xf32>
    %108 = vector.extract_strided_slice %34 {offsets = [32, 0], sizes = [8, 256], strides = [1, 1]} : vector<64x256xf32> to vector<8x256xf32>
    %109 = arith.select %28, %107, %108 : vector<8x256xi1>, vector<8x256xf32>
    %110 = arith.truncf %102 : vector<8x64xf32> to vector<8x64xbf16>
    %cst_24 = arith.constant dense<0.000000e+00> : vector<8x256xf32>
    %111 = tpu.matmul %110, %29, %cst_24 {dimension_numbers = #tpu.dot_dimension_numbers<[1], [0], [0], [1], [0, 0, 1, 1], [], []>} : vector<8x64xbf16>, vector<64x256xbf16>, vector<8x256xf32> -> vector<8x256xf32>
    %112 = arith.addf %109, %111 : vector<8x256xf32>
    %113 = vector.extract_strided_slice %112 {offsets = [0, 0], sizes = [8, 192], strides = [1, 1]} : vector<8x256xf32> to vector<8x192xf32>
    %114 = arith.negf %113 : vector<8x192xf32>
    %115 = math.exp %114 : vector<8x192xf32>
    %cst_25 = arith.constant 1.000000e+00 : f32
    %116 = vector.broadcast %cst_25 : f32 to vector<8x192xf32>
    %117 = arith.addf %116, %115 : vector<8x192xf32>
    %118 = arith.divf %116, %117 : vector<8x192xf32>
    %119 = vector.extract_strided_slice %112 {offsets = [0, 192], sizes = [8, 64], strides = [1, 1]} : vector<8x256xf32> to vector<8x64xf32>
    %120 = math.tanh %119 : vector<8x64xf32>
    %121 = vector.extract_strided_slice %118 {offsets = [0, 0], sizes = [8, 64], strides = [1, 1]} : vector<8x192xf32> to vector<8x64xf32>
    %122 = vector.extract_strided_slice %118 {offsets = [0, 64], sizes = [8, 64], strides = [1, 1]} : vector<8x192xf32> to vector<8x64xf32>
    %123 = vector.extract_strided_slice %118 {offsets = [0, 128], sizes = [8, 64], strides = [1, 1]} : vector<8x192xf32> to vector<8x64xf32>
    %124 = arith.mulf %122, %100 : vector<8x64xf32>
    %125 = arith.mulf %121, %120 : vector<8x64xf32>
    %126 = arith.addf %124, %125 : vector<8x64xf32>
    %127 = math.tanh %126 : vector<8x64xf32>
    %128 = arith.mulf %123, %127 : vector<8x64xf32>
    %129 = vector.extract_strided_slice %128 {offsets = [0, 0], sizes = [8, 32], strides = [1, 1]} : vector<8x64xf32> to vector<8x32xf32>
    %c24 = arith.constant 24 : index
    %c0_26 = arith.constant 0 : index
    %130 = vector.load %arg13[%c24, %c0_26] : memref<64x64xf32, #tpu.memory_space<vmem>>, vector<8x32xf32>
    tpu.vector_store %arg13[%c24, %c0_26], %129 {strides = array<i32>} : memref<64x64xf32, #tpu.memory_space<vmem>>, vector<8x32xf32>,
    %131 = vector.extract_strided_slice %128 {offsets = [0, 32], sizes = [8, 32], strides = [1, 1]} : vector<8x64xf32> to vector<8x32xf32>
    %c32_27 = arith.constant 32 : index
    %c32_28 = arith.constant 32 : index
    %132 = vector.load %arg13[%c32_27, %c32_28] : memref<64x64xf32, #tpu.memory_space<vmem>>, vector<8x32xf32>
    tpu.vector_store %arg13[%c32_27, %c32_28], %131 {strides = array<i32>} : memref<64x64xf32, #tpu.memory_space<vmem>>, vector<8x32xf32>,
    %133 = vector.extract_strided_slice %34 {offsets = [32, 0], sizes = [8, 256], strides = [1, 1]} : vector<64x256xf32> to vector<8x256xf32>
    %134 = vector.extract_strided_slice %34 {offsets = [24, 0], sizes = [8, 256], strides = [1, 1]} : vector<64x256xf32> to vector<8x256xf32>
    %135 = arith.select %28, %133, %134 : vector<8x256xi1>, vector<8x256xf32>
    %136 = arith.truncf %128 : vector<8x64xf32> to vector<8x64xbf16>
    %cst_29 = arith.constant dense<0.000000e+00> : vector<8x256xf32>
    %137 = tpu.matmul %136, %29, %cst_29 {dimension_numbers = #tpu.dot_dimension_numbers<[1], [0], [0], [1], [0, 0, 1, 1], [], []>} : vector<8x64xbf16>, vector<64x256xbf16>, vector<8x256xf32> -> vector<8x256xf32>
    %138 = arith.addf %135, %137 : vector<8x256xf32>
    %139 = vector.extract_strided_slice %138 {offsets = [0, 0], sizes = [8, 192], strides = [1, 1]} : vector<8x256xf32> to vector<8x192xf32>
    %140 = arith.negf %139 : vector<8x192xf32>
    %141 = math.exp %140 : vector<8x192xf32>
    %cst_30 = arith.constant 1.000000e+00 : f32
    %142 = vector.broadcast %cst_30 : f32 to vector<8x192xf32>
    %143 = arith.addf %142, %141 : vector<8x192xf32>
    %144 = arith.divf %142, %143 : vector<8x192xf32>
    %145 = vector.extract_strided_slice %138 {offsets = [0, 192], sizes = [8, 64], strides = [1, 1]} : vector<8x256xf32> to vector<8x64xf32>
    %146 = math.tanh %145 : vector<8x64xf32>
    %147 = vector.extract_strided_slice %144 {offsets = [0, 0], sizes = [8, 64], strides = [1, 1]} : vector<8x192xf32> to vector<8x64xf32>
    %148 = vector.extract_strided_slice %144 {offsets = [0, 64], sizes = [8, 64], strides = [1, 1]} : vector<8x192xf32> to vector<8x64xf32>
    %149 = vector.extract_strided_slice %144 {offsets = [0, 128], sizes = [8, 64], strides = [1, 1]} : vector<8x192xf32> to vector<8x64xf32>
    %150 = arith.mulf %148, %126 : vector<8x64xf32>
    %151 = arith.mulf %147, %146 : vector<8x64xf32>
    %152 = arith.addf %150, %151 : vector<8x64xf32>
    %153 = math.tanh %152 : vector<8x64xf32>
    %154 = arith.mulf %149, %153 : vector<8x64xf32>
    %155 = vector.extract_strided_slice %154 {offsets = [0, 0], sizes = [8, 32], strides = [1, 1]} : vector<8x64xf32> to vector<8x32xf32>
    %c32_31 = arith.constant 32 : index
    %c0_32 = arith.constant 0 : index
    %156 = vector.load %arg13[%c32_31, %c0_32] : memref<64x64xf32, #tpu.memory_space<vmem>>, vector<8x32xf32>
    tpu.vector_store %arg13[%c32_31, %c0_32], %155 {strides = array<i32>} : memref<64x64xf32, #tpu.memory_space<vmem>>, vector<8x32xf32>,
    %157 = vector.extract_strided_slice %154 {offsets = [0, 32], sizes = [8, 32], strides = [1, 1]} : vector<8x64xf32> to vector<8x32xf32>
    %c24_33 = arith.constant 24 : index
    %c32_34 = arith.constant 32 : index
    %158 = vector.load %arg13[%c24_33, %c32_34] : memref<64x64xf32, #tpu.memory_space<vmem>>, vector<8x32xf32>
    tpu.vector_store %arg13[%c24_33, %c32_34], %157 {strides = array<i32>} : memref<64x64xf32, #tpu.memory_space<vmem>>, vector<8x32xf32>,
    %159 = vector.extract_strided_slice %34 {offsets = [40, 0], sizes = [8, 256], strides = [1, 1]} : vector<64x256xf32> to vector<8x256xf32>
    %160 = vector.extract_strided_slice %34 {offsets = [16, 0], sizes = [8, 256], strides = [1, 1]} : vector<64x256xf32> to vector<8x256xf32>
    %161 = arith.select %28, %159, %160 : vector<8x256xi1>, vector<8x256xf32>
    %162 = arith.truncf %154 : vector<8x64xf32> to vector<8x64xbf16>
    %cst_35 = arith.constant dense<0.000000e+00> : vector<8x256xf32>
    %163 = tpu.matmul %162, %29, %cst_35 {dimension_numbers = #tpu.dot_dimension_numbers<[1], [0], [0], [1], [0, 0, 1, 1], [], []>} : vector<8x64xbf16>, vector<64x256xbf16>, vector<8x256xf32> -> vector<8x256xf32>
    %164 = arith.addf %161, %163 : vector<8x256xf32>
    %165 = vector.extract_strided_slice %164 {offsets = [0, 0], sizes = [8, 192], strides = [1, 1]} : vector<8x256xf32> to vector<8x192xf32>
    %166 = arith.negf %165 : vector<8x192xf32>
    %167 = math.exp %166 : vector<8x192xf32>
    %cst_36 = arith.constant 1.000000e+00 : f32
    %168 = vector.broadcast %cst_36 : f32 to vector<8x192xf32>
    %169 = arith.addf %168, %167 : vector<8x192xf32>
    %170 = arith.divf %168, %169 : vector<8x192xf32>
    %171 = vector.extract_strided_slice %164 {offsets = [0, 192], sizes = [8, 64], strides = [1, 1]} : vector<8x256xf32> to vector<8x64xf32>
    %172 = math.tanh %171 : vector<8x64xf32>
    %173 = vector.extract_strided_slice %170 {offsets = [0, 0], sizes = [8, 64], strides = [1, 1]} : vector<8x192xf32> to vector<8x64xf32>
    %174 = vector.extract_strided_slice %170 {offsets = [0, 64], sizes = [8, 64], strides = [1, 1]} : vector<8x192xf32> to vector<8x64xf32>
    %175 = vector.extract_strided_slice %170 {offsets = [0, 128], sizes = [8, 64], strides = [1, 1]} : vector<8x192xf32> to vector<8x64xf32>
    %176 = arith.mulf %174, %152 : vector<8x64xf32>
    %177 = arith.mulf %173, %172 : vector<8x64xf32>
    %178 = arith.addf %176, %177 : vector<8x64xf32>
    %179 = math.tanh %178 : vector<8x64xf32>
    %180 = arith.mulf %175, %179 : vector<8x64xf32>
    %181 = vector.extract_strided_slice %180 {offsets = [0, 0], sizes = [8, 32], strides = [1, 1]} : vector<8x64xf32> to vector<8x32xf32>
    %c40_37 = arith.constant 40 : index
    %c0_38 = arith.constant 0 : index
    %182 = vector.load %arg13[%c40_37, %c0_38] : memref<64x64xf32, #tpu.memory_space<vmem>>, vector<8x32xf32>
    tpu.vector_store %arg13[%c40_37, %c0_38], %181 {strides = array<i32>} : memref<64x64xf32, #tpu.memory_space<vmem>>, vector<8x32xf32>,
    %183 = vector.extract_strided_slice %180 {offsets = [0, 32], sizes = [8, 32], strides = [1, 1]} : vector<8x64xf32> to vector<8x32xf32>
    %c16_39 = arith.constant 16 : index
    %c32_40 = arith.constant 32 : index
    %184 = vector.load %arg13[%c16_39, %c32_40] : memref<64x64xf32, #tpu.memory_space<vmem>>, vector<8x32xf32>
    tpu.vector_store %arg13[%c16_39, %c32_40], %183 {strides = array<i32>} : memref<64x64xf32, #tpu.memory_space<vmem>>, vector<8x32xf32>,
    %185 = vector.extract_strided_slice %34 {offsets = [48, 0], sizes = [8, 256], strides = [1, 1]} : vector<64x256xf32> to vector<8x256xf32>
    %186 = vector.extract_strided_slice %34 {offsets = [8, 0], sizes = [8, 256], strides = [1, 1]} : vector<64x256xf32> to vector<8x256xf32>
    %187 = arith.select %28, %185, %186 : vector<8x256xi1>, vector<8x256xf32>
    %188 = arith.truncf %180 : vector<8x64xf32> to vector<8x64xbf16>
    %cst_41 = arith.constant dense<0.000000e+00> : vector<8x256xf32>
    %189 = tpu.matmul %188, %29, %cst_41 {dimension_numbers = #tpu.dot_dimension_numbers<[1], [0], [0], [1], [0, 0, 1, 1], [], []>} : vector<8x64xbf16>, vector<64x256xbf16>, vector<8x256xf32> -> vector<8x256xf32>
    %190 = arith.addf %187, %189 : vector<8x256xf32>
    %191 = vector.extract_strided_slice %190 {offsets = [0, 0], sizes = [8, 192], strides = [1, 1]} : vector<8x256xf32> to vector<8x192xf32>
    %192 = arith.negf %191 : vector<8x192xf32>
    %193 = math.exp %192 : vector<8x192xf32>
    %cst_42 = arith.constant 1.000000e+00 : f32
    %194 = vector.broadcast %cst_42 : f32 to vector<8x192xf32>
    %195 = arith.addf %194, %193 : vector<8x192xf32>
    %196 = arith.divf %194, %195 : vector<8x192xf32>
    %197 = vector.extract_strided_slice %190 {offsets = [0, 192], sizes = [8, 64], strides = [1, 1]} : vector<8x256xf32> to vector<8x64xf32>
    %198 = math.tanh %197 : vector<8x64xf32>
    %199 = vector.extract_strided_slice %196 {offsets = [0, 0], sizes = [8, 64], strides = [1, 1]} : vector<8x192xf32> to vector<8x64xf32>
    %200 = vector.extract_strided_slice %196 {offsets = [0, 64], sizes = [8, 64], strides = [1, 1]} : vector<8x192xf32> to vector<8x64xf32>
    %201 = vector.extract_strided_slice %196 {offsets = [0, 128], sizes = [8, 64], strides = [1, 1]} : vector<8x192xf32> to vector<8x64xf32>
    %202 = arith.mulf %200, %178 : vector<8x64xf32>
    %203 = arith.mulf %199, %198 : vector<8x64xf32>
    %204 = arith.addf %202, %203 : vector<8x64xf32>
    %205 = math.tanh %204 : vector<8x64xf32>
    %206 = arith.mulf %201, %205 : vector<8x64xf32>
    %207 = vector.extract_strided_slice %206 {offsets = [0, 0], sizes = [8, 32], strides = [1, 1]} : vector<8x64xf32> to vector<8x32xf32>
    %c48_43 = arith.constant 48 : index
    %c0_44 = arith.constant 0 : index
    %208 = vector.load %arg13[%c48_43, %c0_44] : memref<64x64xf32, #tpu.memory_space<vmem>>, vector<8x32xf32>
    tpu.vector_store %arg13[%c48_43, %c0_44], %207 {strides = array<i32>} : memref<64x64xf32, #tpu.memory_space<vmem>>, vector<8x32xf32>,
    %209 = vector.extract_strided_slice %206 {offsets = [0, 32], sizes = [8, 32], strides = [1, 1]} : vector<8x64xf32> to vector<8x32xf32>
    %c8_45 = arith.constant 8 : index
    %c32_46 = arith.constant 32 : index
    %210 = vector.load %arg13[%c8_45, %c32_46] : memref<64x64xf32, #tpu.memory_space<vmem>>, vector<8x32xf32>
    tpu.vector_store %arg13[%c8_45, %c32_46], %209 {strides = array<i32>} : memref<64x64xf32, #tpu.memory_space<vmem>>, vector<8x32xf32>,
    %211 = vector.extract_strided_slice %34 {offsets = [56, 0], sizes = [8, 256], strides = [1, 1]} : vector<64x256xf32> to vector<8x256xf32>
    %212 = vector.extract_strided_slice %34 {offsets = [0, 0], sizes = [8, 256], strides = [1, 1]} : vector<64x256xf32> to vector<8x256xf32>
    %213 = arith.select %28, %211, %212 : vector<8x256xi1>, vector<8x256xf32>
    %214 = arith.truncf %206 : vector<8x64xf32> to vector<8x64xbf16>
    %cst_47 = arith.constant dense<0.000000e+00> : vector<8x256xf32>
    %215 = tpu.matmul %214, %29, %cst_47 {dimension_numbers = #tpu.dot_dimension_numbers<[1], [0], [0], [1], [0, 0, 1, 1], [], []>} : vector<8x64xbf16>, vector<64x256xbf16>, vector<8x256xf32> -> vector<8x256xf32>
    %216 = arith.addf %213, %215 : vector<8x256xf32>
    %217 = vector.extract_strided_slice %216 {offsets = [0, 0], sizes = [8, 192], strides = [1, 1]} : vector<8x256xf32> to vector<8x192xf32>
    %218 = arith.negf %217 : vector<8x192xf32>
    %219 = math.exp %218 : vector<8x192xf32>
    %cst_48 = arith.constant 1.000000e+00 : f32
    %220 = vector.broadcast %cst_48 : f32 to vector<8x192xf32>
    %221 = arith.addf %220, %219 : vector<8x192xf32>
    %222 = arith.divf %220, %221 : vector<8x192xf32>
    %223 = vector.extract_strided_slice %216 {offsets = [0, 192], sizes = [8, 64], strides = [1, 1]} : vector<8x256xf32> to vector<8x64xf32>
    %224 = math.tanh %223 : vector<8x64xf32>
    %225 = vector.extract_strided_slice %222 {offsets = [0, 0], sizes = [8, 64], strides = [1, 1]} : vector<8x192xf32> to vector<8x64xf32>
    %226 = vector.extract_strided_slice %222 {offsets = [0, 64], sizes = [8, 64], strides = [1, 1]} : vector<8x192xf32> to vector<8x64xf32>
    %227 = vector.extract_strided_slice %222 {offsets = [0, 128], sizes = [8, 64], strides = [1, 1]} : vector<8x192xf32> to vector<8x64xf32>
    %228 = arith.mulf %226, %204 : vector<8x64xf32>
    %229 = arith.mulf %225, %224 : vector<8x64xf32>
    %230 = arith.addf %228, %229 : vector<8x64xf32>
    %231 = math.tanh %230 : vector<8x64xf32>
    %232 = arith.mulf %227, %231 : vector<8x64xf32>
    %233 = vector.extract_strided_slice %232 {offsets = [0, 0], sizes = [8, 32], strides = [1, 1]} : vector<8x64xf32> to vector<8x32xf32>
    %c56_49 = arith.constant 56 : index
    %c0_50 = arith.constant 0 : index
    %234 = vector.load %arg13[%c56_49, %c0_50] : memref<64x64xf32, #tpu.memory_space<vmem>>, vector<8x32xf32>
    tpu.vector_store %arg13[%c56_49, %c0_50], %233 {strides = array<i32>} : memref<64x64xf32, #tpu.memory_space<vmem>>, vector<8x32xf32>,
    %235 = vector.extract_strided_slice %232 {offsets = [0, 32], sizes = [8, 32], strides = [1, 1]} : vector<8x64xf32> to vector<8x32xf32>
    %c0_51 = arith.constant 0 : index
    %c32_52 = arith.constant 32 : index
    %236 = vector.load %arg13[%c0_51, %c32_52] : memref<64x64xf32, #tpu.memory_space<vmem>>, vector<8x32xf32>
    tpu.vector_store %arg13[%c0_51, %c32_52], %235 {strides = array<i32>} : memref<64x64xf32, #tpu.memory_space<vmem>>, vector<8x32xf32>,
    %c0_53 = arith.constant 0 : index
    %c0_54 = arith.constant 0 : index
    %237 = vector.load %arg13[%c0_53, %c0_54] : memref<64x64xf32, #tpu.memory_space<vmem>>, vector<64x64xf32>
    %238 = arith.truncf %237 : vector<64x64xf32> to vector<64x64xbf16>
    %c0_55 = arith.constant 0 : index
    %c0_56 = arith.constant 0 : index
    %239 = vector.load %arg6[%c0_55, %c0_56] : memref<64x256xbf16, #tpu.memory_space<vmem>>, vector<64x256xbf16>
    %c0_57 = arith.constant 0 : index
    %c0_58 = arith.constant 0 : index
    %240 = vector.load %arg5[%c0_57, %c0_58] : memref<64x256xbf16, #tpu.memory_space<vmem>>, vector<64x256xbf16>
    %cst_59 = arith.constant dense<0.000000e+00> : vector<64x256xf32>
    %241 = tpu.matmul %238, %240, %cst_59 {dimension_numbers = #tpu.dot_dimension_numbers<[1], [0], [0], [1], [0, 0, 1, 1], [], []>} : vector<64x64xbf16>, vector<64x256xbf16>, vector<64x256xf32> -> vector<64x256xf32>
    %c0_60 = arith.constant 0 : index
    %c0_61 = arith.constant 0 : index
    %242 = vector.load %arg7[%c0_60, %c0_61] : memref<1x256xf32, #tpu.memory_space<vmem>>, vector<1x256xf32>
    %243 = vector.broadcast %242 : vector<1x256xf32> to vector<64x256xf32>
    %244 = arith.addf %241, %243 : vector<64x256xf32>
    %245 = vector.extract_strided_slice %244 {offsets = [0, 0], sizes = [8, 256], strides = [1, 1]} : vector<64x256xf32> to vector<8x256xf32>
    %246 = vector.extract_strided_slice %244 {offsets = [56, 0], sizes = [8, 256], strides = [1, 1]} : vector<64x256xf32> to vector<8x256xf32>
    %247 = arith.select %28, %245, %246 : vector<8x256xi1>, vector<8x256xf32>
    %248 = vector.extract_strided_slice %247 {offsets = [0, 0], sizes = [8, 192], strides = [1, 1]} : vector<8x256xf32> to vector<8x192xf32>
    %249 = arith.negf %248 : vector<8x192xf32>
    %250 = math.exp %249 : vector<8x192xf32>
    %cst_62 = arith.constant 1.000000e+00 : f32
    %251 = vector.broadcast %cst_62 : f32 to vector<8x192xf32>
    %252 = arith.addf %251, %250 : vector<8x192xf32>
    %253 = arith.divf %251, %252 : vector<8x192xf32>
    %254 = vector.extract_strided_slice %247 {offsets = [0, 192], sizes = [8, 64], strides = [1, 1]} : vector<8x256xf32> to vector<8x64xf32>
    %255 = math.tanh %254 : vector<8x64xf32>
    %256 = vector.extract_strided_slice %253 {offsets = [0, 0], sizes = [8, 64], strides = [1, 1]} : vector<8x192xf32> to vector<8x64xf32>
    %257 = vector.extract_strided_slice %253 {offsets = [0, 128], sizes = [8, 64], strides = [1, 1]} : vector<8x192xf32> to vector<8x64xf32>
    %258 = arith.mulf %256, %255 : vector<8x64xf32>
    %259 = math.tanh %258 : vector<8x64xf32>
    %260 = arith.mulf %257, %259 : vector<8x64xf32>
    %261 = vector.extract_strided_slice %260 {offsets = [0, 32], sizes = [8, 32], strides = [1, 1]} : vector<8x64xf32> to vector<8x32xf32>
    %262 = vector.extract_strided_slice %244 {offsets = [8, 0], sizes = [8, 256], strides = [1, 1]} : vector<64x256xf32> to vector<8x256xf32>
    %263 = vector.extract_strided_slice %244 {offsets = [48, 0], sizes = [8, 256], strides = [1, 1]} : vector<64x256xf32> to vector<8x256xf32>
    %264 = arith.select %28, %262, %263 : vector<8x256xi1>, vector<8x256xf32>
    %265 = arith.truncf %260 : vector<8x64xf32> to vector<8x64xbf16>
    %cst_63 = arith.constant dense<0.000000e+00> : vector<8x256xf32>
    %266 = tpu.matmul %265, %239, %cst_63 {dimension_numbers = #tpu.dot_dimension_numbers<[1], [0], [0], [1], [0, 0, 1, 1], [], []>} : vector<8x64xbf16>, vector<64x256xbf16>, vector<8x256xf32> -> vector<8x256xf32>
    %267 = arith.addf %264, %266 : vector<8x256xf32>
    %268 = vector.extract_strided_slice %267 {offsets = [0, 0], sizes = [8, 192], strides = [1, 1]} : vector<8x256xf32> to vector<8x192xf32>
    %269 = arith.negf %268 : vector<8x192xf32>
    %270 = math.exp %269 : vector<8x192xf32>
    %cst_64 = arith.constant 1.000000e+00 : f32
    %271 = vector.broadcast %cst_64 : f32 to vector<8x192xf32>
    %272 = arith.addf %271, %270 : vector<8x192xf32>
    %273 = arith.divf %271, %272 : vector<8x192xf32>
    %274 = vector.extract_strided_slice %267 {offsets = [0, 192], sizes = [8, 64], strides = [1, 1]} : vector<8x256xf32> to vector<8x64xf32>
    %275 = math.tanh %274 : vector<8x64xf32>
    %276 = vector.extract_strided_slice %273 {offsets = [0, 0], sizes = [8, 64], strides = [1, 1]} : vector<8x192xf32> to vector<8x64xf32>
    %277 = vector.extract_strided_slice %273 {offsets = [0, 64], sizes = [8, 64], strides = [1, 1]} : vector<8x192xf32> to vector<8x64xf32>
    %278 = vector.extract_strided_slice %273 {offsets = [0, 128], sizes = [8, 64], strides = [1, 1]} : vector<8x192xf32> to vector<8x64xf32>
    %279 = arith.mulf %277, %258 : vector<8x64xf32>
    %280 = arith.mulf %276, %275 : vector<8x64xf32>
    %281 = arith.addf %279, %280 : vector<8x64xf32>
    %282 = math.tanh %281 : vector<8x64xf32>
    %283 = arith.mulf %278, %282 : vector<8x64xf32>
    %284 = vector.extract_strided_slice %244 {offsets = [16, 0], sizes = [8, 256], strides = [1, 1]} : vector<64x256xf32> to vector<8x256xf32>
    %285 = vector.extract_strided_slice %244 {offsets = [40, 0], sizes = [8, 256], strides = [1, 1]} : vector<64x256xf32> to vector<8x256xf32>
    %286 = arith.select %28, %284, %285 : vector<8x256xi1>, vector<8x256xf32>
    %287 = arith.truncf %283 : vector<8x64xf32> to vector<8x64xbf16>
    %cst_65 = arith.constant dense<0.000000e+00> : vector<8x256xf32>
    %288 = tpu.matmul %287, %239, %cst_65 {dimension_numbers = #tpu.dot_dimension_numbers<[1], [0], [0], [1], [0, 0, 1, 1], [], []>} : vector<8x64xbf16>, vector<64x256xbf16>, vector<8x256xf32> -> vector<8x256xf32>
    %289 = arith.addf %286, %288 : vector<8x256xf32>
    %290 = vector.extract_strided_slice %289 {offsets = [0, 0], sizes = [8, 192], strides = [1, 1]} : vector<8x256xf32> to vector<8x192xf32>
    %291 = arith.negf %290 : vector<8x192xf32>
    %292 = math.exp %291 : vector<8x192xf32>
    %cst_66 = arith.constant 1.000000e+00 : f32
    %293 = vector.broadcast %cst_66 : f32 to vector<8x192xf32>
    %294 = arith.addf %293, %292 : vector<8x192xf32>
    %295 = arith.divf %293, %294 : vector<8x192xf32>
    %296 = vector.extract_strided_slice %289 {offsets = [0, 192], sizes = [8, 64], strides = [1, 1]} : vector<8x256xf32> to vector<8x64xf32>
    %297 = math.tanh %296 : vector<8x64xf32>
    %298 = vector.extract_strided_slice %295 {offsets = [0, 0], sizes = [8, 64], strides = [1, 1]} : vector<8x192xf32> to vector<8x64xf32>
    %299 = vector.extract_strided_slice %295 {offsets = [0, 64], sizes = [8, 64], strides = [1, 1]} : vector<8x192xf32> to vector<8x64xf32>
    %300 = vector.extract_strided_slice %295 {offsets = [0, 128], sizes = [8, 64], strides = [1, 1]} : vector<8x192xf32> to vector<8x64xf32>
    %301 = arith.mulf %299, %281 : vector<8x64xf32>
    %302 = arith.mulf %298, %297 : vector<8x64xf32>
    %303 = arith.addf %301, %302 : vector<8x64xf32>
    %304 = math.tanh %303 : vector<8x64xf32>
    %305 = arith.mulf %300, %304 : vector<8x64xf32>
    %306 = vector.extract_strided_slice %244 {offsets = [24, 0], sizes = [8, 256], strides = [1, 1]} : vector<64x256xf32> to vector<8x256xf32>
    %307 = vector.extract_strided_slice %244 {offsets = [32, 0], sizes = [8, 256], strides = [1, 1]} : vector<64x256xf32> to vector<8x256xf32>
    %308 = arith.select %28, %306, %307 : vector<8x256xi1>, vector<8x256xf32>
    %309 = arith.truncf %305 : vector<8x64xf32> to vector<8x64xbf16>
    %cst_67 = arith.constant dense<0.000000e+00> : vector<8x256xf32>
    %310 = tpu.matmul %309, %239, %cst_67 {dimension_numbers = #tpu.dot_dimension_numbers<[1], [0], [0], [1], [0, 0, 1, 1], [], []>} : vector<8x64xbf16>, vector<64x256xbf16>, vector<8x256xf32> -> vector<8x256xf32>
    %311 = arith.addf %308, %310 : vector<8x256xf32>
    %312 = vector.extract_strided_slice %311 {offsets = [0, 0], sizes = [8, 192], strides = [1, 1]} : vector<8x256xf32> to vector<8x192xf32>
    %313 = arith.negf %312 : vector<8x192xf32>
    %314 = math.exp %313 : vector<8x192xf32>
    %cst_68 = arith.constant 1.000000e+00 : f32
    %315 = vector.broadcast %cst_68 : f32 to vector<8x192xf32>
    %316 = arith.addf %315, %314 : vector<8x192xf32>
    %317 = arith.divf %315, %316 : vector<8x192xf32>
    %318 = vector.extract_strided_slice %311 {offsets = [0, 192], sizes = [8, 64], strides = [1, 1]} : vector<8x256xf32> to vector<8x64xf32>
    %319 = math.tanh %318 : vector<8x64xf32>
    %320 = vector.extract_strided_slice %317 {offsets = [0, 0], sizes = [8, 64], strides = [1, 1]} : vector<8x192xf32> to vector<8x64xf32>
    %321 = vector.extract_strided_slice %317 {offsets = [0, 64], sizes = [8, 64], strides = [1, 1]} : vector<8x192xf32> to vector<8x64xf32>
    %322 = vector.extract_strided_slice %317 {offsets = [0, 128], sizes = [8, 64], strides = [1, 1]} : vector<8x192xf32> to vector<8x64xf32>
    %323 = arith.mulf %321, %303 : vector<8x64xf32>
    %324 = arith.mulf %320, %319 : vector<8x64xf32>
    %325 = arith.addf %323, %324 : vector<8x64xf32>
    %326 = math.tanh %325 : vector<8x64xf32>
    %327 = arith.mulf %322, %326 : vector<8x64xf32>
    %328 = vector.extract_strided_slice %244 {offsets = [32, 0], sizes = [8, 256], strides = [1, 1]} : vector<64x256xf32> to vector<8x256xf32>
    %329 = vector.extract_strided_slice %244 {offsets = [24, 0], sizes = [8, 256], strides = [1, 1]} : vector<64x256xf32> to vector<8x256xf32>
    %330 = arith.select %28, %328, %329 : vector<8x256xi1>, vector<8x256xf32>
    %331 = arith.truncf %327 : vector<8x64xf32> to vector<8x64xbf16>
    %cst_69 = arith.constant dense<0.000000e+00> : vector<8x256xf32>
    %332 = tpu.matmul %331, %239, %cst_69 {dimension_numbers = #tpu.dot_dimension_numbers<[1], [0], [0], [1], [0, 0, 1, 1], [], []>} : vector<8x64xbf16>, vector<64x256xbf16>, vector<8x256xf32> -> vector<8x256xf32>
    %333 = arith.addf %330, %332 : vector<8x256xf32>
    %334 = vector.extract_strided_slice %333 {offsets = [0, 0], sizes = [8, 192], strides = [1, 1]} : vector<8x256xf32> to vector<8x192xf32>
    %335 = arith.negf %334 : vector<8x192xf32>
    %336 = math.exp %335 : vector<8x192xf32>
    %cst_70 = arith.constant 1.000000e+00 : f32
    %337 = vector.broadcast %cst_70 : f32 to vector<8x192xf32>
    %338 = arith.addf %337, %336 : vector<8x192xf32>
    %339 = arith.divf %337, %338 : vector<8x192xf32>
    %340 = vector.extract_strided_slice %333 {offsets = [0, 192], sizes = [8, 64], strides = [1, 1]} : vector<8x256xf32> to vector<8x64xf32>
    %341 = math.tanh %340 : vector<8x64xf32>
    %342 = vector.extract_strided_slice %339 {offsets = [0, 0], sizes = [8, 64], strides = [1, 1]} : vector<8x192xf32> to vector<8x64xf32>
    %343 = vector.extract_strided_slice %339 {offsets = [0, 64], sizes = [8, 64], strides = [1, 1]} : vector<8x192xf32> to vector<8x64xf32>
    %344 = vector.extract_strided_slice %339 {offsets = [0, 128], sizes = [8, 64], strides = [1, 1]} : vector<8x192xf32> to vector<8x64xf32>
    %345 = arith.mulf %343, %325 : vector<8x64xf32>
    %346 = arith.mulf %342, %341 : vector<8x64xf32>
    %347 = arith.addf %345, %346 : vector<8x64xf32>
    %348 = math.tanh %347 : vector<8x64xf32>
    %349 = arith.mulf %344, %348 : vector<8x64xf32>
    %350 = vector.extract_strided_slice %244 {offsets = [40, 0], sizes = [8, 256], strides = [1, 1]} : vector<64x256xf32> to vector<8x256xf32>
    %351 = vector.extract_strided_slice %244 {offsets = [16, 0], sizes = [8, 256], strides = [1, 1]} : vector<64x256xf32> to vector<8x256xf32>
    %352 = arith.select %28, %350, %351 : vector<8x256xi1>, vector<8x256xf32>
    %353 = arith.truncf %349 : vector<8x64xf32> to vector<8x64xbf16>
    %cst_71 = arith.constant dense<0.000000e+00> : vector<8x256xf32>
    %354 = tpu.matmul %353, %239, %cst_71 {dimension_numbers = #tpu.dot_dimension_numbers<[1], [0], [0], [1], [0, 0, 1, 1], [], []>} : vector<8x64xbf16>, vector<64x256xbf16>, vector<8x256xf32> -> vector<8x256xf32>
    %355 = arith.addf %352, %354 : vector<8x256xf32>
    %356 = vector.extract_strided_slice %355 {offsets = [0, 0], sizes = [8, 192], strides = [1, 1]} : vector<8x256xf32> to vector<8x192xf32>
    %357 = arith.negf %356 : vector<8x192xf32>
    %358 = math.exp %357 : vector<8x192xf32>
    %cst_72 = arith.constant 1.000000e+00 : f32
    %359 = vector.broadcast %cst_72 : f32 to vector<8x192xf32>
    %360 = arith.addf %359, %358 : vector<8x192xf32>
    %361 = arith.divf %359, %360 : vector<8x192xf32>
    %362 = vector.extract_strided_slice %355 {offsets = [0, 192], sizes = [8, 64], strides = [1, 1]} : vector<8x256xf32> to vector<8x64xf32>
    %363 = math.tanh %362 : vector<8x64xf32>
    %364 = vector.extract_strided_slice %361 {offsets = [0, 0], sizes = [8, 64], strides = [1, 1]} : vector<8x192xf32> to vector<8x64xf32>
    %365 = vector.extract_strided_slice %361 {offsets = [0, 64], sizes = [8, 64], strides = [1, 1]} : vector<8x192xf32> to vector<8x64xf32>
    %366 = vector.extract_strided_slice %361 {offsets = [0, 128], sizes = [8, 64], strides = [1, 1]} : vector<8x192xf32> to vector<8x64xf32>
    %367 = arith.mulf %365, %347 : vector<8x64xf32>
    %368 = arith.mulf %364, %363 : vector<8x64xf32>
    %369 = arith.addf %367, %368 : vector<8x64xf32>
    %370 = math.tanh %369 : vector<8x64xf32>
    %371 = arith.mulf %366, %370 : vector<8x64xf32>
    %372 = vector.extract_strided_slice %244 {offsets = [48, 0], sizes = [8, 256], strides = [1, 1]} : vector<64x256xf32> to vector<8x256xf32>
    %373 = vector.extract_strided_slice %244 {offsets = [8, 0], sizes = [8, 256], strides = [1, 1]} : vector<64x256xf32> to vector<8x256xf32>
    %374 = arith.select %28, %372, %373 : vector<8x256xi1>, vector<8x256xf32>
    %375 = arith.truncf %371 : vector<8x64xf32> to vector<8x64xbf16>
    %cst_73 = arith.constant dense<0.000000e+00> : vector<8x256xf32>
    %376 = tpu.matmul %375, %239, %cst_73 {dimension_numbers = #tpu.dot_dimension_numbers<[1], [0], [0], [1], [0, 0, 1, 1], [], []>} : vector<8x64xbf16>, vector<64x256xbf16>, vector<8x256xf32> -> vector<8x256xf32>
    %377 = arith.addf %374, %376 : vector<8x256xf32>
    %378 = vector.extract_strided_slice %377 {offsets = [0, 0], sizes = [8, 192], strides = [1, 1]} : vector<8x256xf32> to vector<8x192xf32>
    %379 = arith.negf %378 : vector<8x192xf32>
    %380 = math.exp %379 : vector<8x192xf32>
    %cst_74 = arith.constant 1.000000e+00 : f32
    %381 = vector.broadcast %cst_74 : f32 to vector<8x192xf32>
    %382 = arith.addf %381, %380 : vector<8x192xf32>
    %383 = arith.divf %381, %382 : vector<8x192xf32>
    %384 = vector.extract_strided_slice %377 {offsets = [0, 192], sizes = [8, 64], strides = [1, 1]} : vector<8x256xf32> to vector<8x64xf32>
    %385 = math.tanh %384 : vector<8x64xf32>
    %386 = vector.extract_strided_slice %383 {offsets = [0, 0], sizes = [8, 64], strides = [1, 1]} : vector<8x192xf32> to vector<8x64xf32>
    %387 = vector.extract_strided_slice %383 {offsets = [0, 64], sizes = [8, 64], strides = [1, 1]} : vector<8x192xf32> to vector<8x64xf32>
    %388 = vector.extract_strided_slice %383 {offsets = [0, 128], sizes = [8, 64], strides = [1, 1]} : vector<8x192xf32> to vector<8x64xf32>
    %389 = arith.mulf %387, %369 : vector<8x64xf32>
    %390 = arith.mulf %386, %385 : vector<8x64xf32>
    %391 = arith.addf %389, %390 : vector<8x64xf32>
    %392 = math.tanh %391 : vector<8x64xf32>
    %393 = arith.mulf %388, %392 : vector<8x64xf32>
    %394 = vector.extract_strided_slice %244 {offsets = [56, 0], sizes = [8, 256], strides = [1, 1]} : vector<64x256xf32> to vector<8x256xf32>
    %395 = vector.extract_strided_slice %244 {offsets = [0, 0], sizes = [8, 256], strides = [1, 1]} : vector<64x256xf32> to vector<8x256xf32>
    %396 = arith.select %28, %394, %395 : vector<8x256xi1>, vector<8x256xf32>
    %397 = arith.truncf %393 : vector<8x64xf32> to vector<8x64xbf16>
    %cst_75 = arith.constant dense<0.000000e+00> : vector<8x256xf32>
    %398 = tpu.matmul %397, %239, %cst_75 {dimension_numbers = #tpu.dot_dimension_numbers<[1], [0], [0], [1], [0, 0, 1, 1], [], []>} : vector<8x64xbf16>, vector<64x256xbf16>, vector<8x256xf32> -> vector<8x256xf32>
    %399 = arith.addf %396, %398 : vector<8x256xf32>
    %400 = vector.extract_strided_slice %399 {offsets = [0, 0], sizes = [8, 192], strides = [1, 1]} : vector<8x256xf32> to vector<8x192xf32>
    %401 = arith.negf %400 : vector<8x192xf32>
    %402 = math.exp %401 : vector<8x192xf32>
    %cst_76 = arith.constant 1.000000e+00 : f32
    %403 = vector.broadcast %cst_76 : f32 to vector<8x192xf32>
    %404 = arith.addf %403, %402 : vector<8x192xf32>
    %405 = arith.divf %403, %404 : vector<8x192xf32>
    %406 = vector.extract_strided_slice %399 {offsets = [0, 192], sizes = [8, 64], strides = [1, 1]} : vector<8x256xf32> to vector<8x64xf32>
    %407 = math.tanh %406 : vector<8x64xf32>
    %408 = vector.extract_strided_slice %405 {offsets = [0, 0], sizes = [8, 64], strides = [1, 1]} : vector<8x192xf32> to vector<8x64xf32>
    %409 = vector.extract_strided_slice %405 {offsets = [0, 64], sizes = [8, 64], strides = [1, 1]} : vector<8x192xf32> to vector<8x64xf32>
    %410 = vector.extract_strided_slice %405 {offsets = [0, 128], sizes = [8, 64], strides = [1, 1]} : vector<8x192xf32> to vector<8x64xf32>
    %411 = arith.mulf %409, %391 : vector<8x64xf32>
    %412 = arith.mulf %408, %407 : vector<8x64xf32>
    %413 = arith.addf %411, %412 : vector<8x64xf32>
    %414 = math.tanh %413 : vector<8x64xf32>
    %415 = arith.mulf %410, %414 : vector<8x64xf32>
    %416 = vector.extract_strided_slice %415 {offsets = [0, 0], sizes = [8, 32], strides = [1, 1]} : vector<8x64xf32> to vector<8x32xf32>
    %417 = arith.truncf %416 : vector<8x32xf32> to vector<8x32xbf16>
    %c0_77 = arith.constant 0 : index
    %c0_78 = arith.constant 0 : index
    %418 = vector.load %arg8[%c0_77, %c0_78] : memref<64x256xbf16, #tpu.memory_space<vmem>>, vector<32x256xbf16>
    %cst_79 = arith.constant dense<0.000000e+00> : vector<8x256xf32>
    %419 = tpu.matmul %417, %418, %cst_79 {dimension_numbers = #tpu.dot_dimension_numbers<[1], [0], [0], [1], [0, 0, 1, 1], [], []>} : vector<8x32xbf16>, vector<32x256xbf16>, vector<8x256xf32> -> vector<8x256xf32>
    %420 = arith.truncf %261 : vector<8x32xf32> to vector<8x32xbf16>
    %c32_80 = arith.constant 32 : index
    %c0_81 = arith.constant 0 : index
    %421 = vector.load %arg8[%c32_80, %c0_81] : memref<64x256xbf16, #tpu.memory_space<vmem>>, vector<32x256xbf16>
    %cst_82 = arith.constant dense<0.000000e+00> : vector<8x256xf32>
    %422 = tpu.matmul %420, %421, %cst_82 {dimension_numbers = #tpu.dot_dimension_numbers<[1], [0], [0], [1], [0, 0, 1, 1], [], []>} : vector<8x32xbf16>, vector<32x256xbf16>, vector<8x256xf32> -> vector<8x256xf32>
    %423 = arith.addf %419, %422 : vector<8x256xf32>
    %c0_83 = arith.constant 0 : index
    %c0_84 = arith.constant 0 : index
    %424 = vector.load %arg9[%c0_83, %c0_84] : memref<1x256xf32, #tpu.memory_space<vmem>>, vector<1x256xf32>
    %425 = vector.broadcast %424 : vector<1x256xf32> to vector<8x256xf32>
    %426 = arith.addf %423, %425 : vector<8x256xf32>
    %cst_85 = arith.constant 0.000000e+00 : f32
    %427 = vector.broadcast %cst_85 : f32 to vector<8x256xf32>
    %428 = arith.maximumf %426, %427 : vector<8x256xf32>
    %429 = arith.truncf %428 : vector<8x256xf32> to vector<8x256xbf16>
    %c0_86 = arith.constant 0 : index
    %c0_87 = arith.constant 0 : index
    %430 = vector.load %arg10[%c0_86, %c0_87] : memref<256x128xbf16, #tpu.memory_space<vmem>>, vector<256x128xbf16>
    %cst_88 = arith.constant dense<0.000000e+00> : vector<8x128xf32>
    %431 = tpu.matmul %429, %430, %cst_88 {dimension_numbers = #tpu.dot_dimension_numbers<[1], [0], [0], [1], [0, 0, 1, 1], [], []>} : vector<8x256xbf16>, vector<256x128xbf16>, vector<8x128xf32> -> vector<8x128xf32>
    %c0_89 = arith.constant 0 : index
    %c0_90 = arith.constant 0 : index
    %432 = vector.load %arg11[%c0_89, %c0_90] : memref<1x128xf32, #tpu.memory_space<vmem>>, vector<1x128xf32>
    %433 = vector.broadcast %432 : vector<1x128xf32> to vector<8x128xf32>
    %434 = arith.addf %431, %433 : vector<8x128xf32>
    %c0_91 = arith.constant 0 : index
    %c0_92 = arith.constant 0 : index
    %435 = vector.load %arg12[%c0_91, %c0_92] : memref<8x128xf32, #tpu.memory_space<vmem>>, vector<8x128xf32>
    tpu.vector_store %arg12[%c0_91, %c0_92], %434 {strides = array<i32>} : memref<8x128xf32, #tpu.memory_space<vmem>>, vector<8x128xf32>,
    return
  }
}

</mosaic_0001>

<bundles_post_ra>
// kernel: _model_forward_impl.1
= control target key start
LH: loop header
LB: loop body
LE: loop exit
PB: predicated region body
PF: predicated region fallthrough
CT: control target
= control target key end

     0   :  { %v2624_v0 = vmov 0   ;;  %v50_v19 = vlaneseq  ;;  %v2625_v25 = vmov 1.0|1.0   ;;  %vm308_vm12 = vcmask 261120   ;;  %s2627_s20 = smov 96   ;;  %s3534_s0 = inlined_call_operand.vmem [shape: s32[64,1], index: 0, kind: input, shape index: {}]   ;;  %s3535_s1 = inlined_call_operand.vmem [shape: bf16[128,32], index: 1, kind: input, shape index: {}]   ;;  %s3536_s2 = inlined_call_operand.vmem [shape: bf16[32,256], index: 2, kind: input, shape index: {}]   ;;  %s3537_s4 = inlined_call_operand.vmem [shape: f32[1,256], index: 4, kind: input, shape index: {}]   ;;  %s3538_s3 = inlined_call_operand.vmem [shape: bf16[64,256], index: 3, kind: input, shape index: {}]   ;;  %s3539_s5 = inlined_call_operand.vmem [shape: bf16[64,256], index: 5, kind: input, shape index: {}]   ;;  %s3540_s7 = inlined_call_operand.vmem [shape: f32[1,256], index: 7, kind: input, shape index: {}]   ;;  %s3541_s6 = inlined_call_operand.vmem [shape: bf16[64,256], index: 6, kind: input, shape index: {}]   ;;  %s3542_s8 = inlined_call_operand.vmem [shape: bf16[64,256], index: 8, kind: input, shape index: {}]   ;;  %s3543_s10 = inlined_call_operand.vmem [shape: bf16[256,128], index: 10, kind: input, shape index: {}]   ;;  %s3544_s9 = inlined_call_operand.vmem [shape: f32[1,256], index: 9, kind: input, shape index: {}]   ;;  %s3545_s11 = inlined_call_operand.vmem [shape: f32[1,128], index: 11, kind: input, shape index: {}]   ;;  %s3546_s12 = inlined_call_operand.vmem [shape: f32[8,128], index: 12, kind: output, shape index: {}]  }
   0x1   :  { %2353 = vset.pattern.permute.xlu1 %v2624_v0  ;;  %2352 = vset.pattern.permute.xlu0 %v2624_v0  ;;  %v44_v1 = vld [vmem:[%s3534_s0 + $0x10] sm:$0xff]  ;;  %v42_v2 = vld [vmem:[%s3534_s0] sm:$0xff]  ;;  %v45_v3 = vld [vmem:[%s3534_s0 + $0x18] sm:$0xff]  ;;  %vm417_vm15 = vcmask 523520  }
   0x2   :  { %59 = vperm.xlu1 %2353, %v44_v1   ;;  %53 = vperm.xlu0 %2352, %v42_v2   ;;  %v43_v4 = vld [vmem:[%s3534_s0 + $0x8] sm:$0xff]  ;;  %v2354_v5 = vld [vmem:[%s3535_s1] sm:$0xff]   ;;  %v2356_v9 = vld [vmem:[%s3535_s1 + $0x10] sm:$0xff]   ;;  %v2750_v22 = vand.u32 127, %v50_v19  ;;  %v279_v44 = vshrl.u32 %v50_v19, 7 }
   0x3   :  { %373 = vmatprep.mubr.bf16.mxu1 %v2624_v0  ;;  %v2355_v6 = vld [vmem:[%s3535_s1 + $0x8] sm:$0xff]   ;;  %v46_v8 = vld [vmem:[%s3534_s0 + $0x20] sm:$0xff]  ;;  %2320 = vmatprep.subr.bf16.mxu0 %v2354_v5  ;;  %v49_v10 = vld [vmem:[%s3534_s0 + $0x38] sm:$0xff] }
   0x4   :  { %v47_v7 = vld [vmem:[%s3534_s0 + $0x28] sm:$0xff]  ;;  %2321 = vmatpush3.bf16.msra.mxu0 %v2354_v5  ;;  %v48_v11 = vld [vmem:[%s3534_s0 + $0x30] sm:$0xff]  ;;  %v2357_v12 = vld [vmem:[%s3535_s1 + $0x18] sm:$0xff]   ;;  %v2775_v45 = vsub.s32 0, %v279_v44  ;;  %v2780_v47 = vsub.s32 1, %v279_v44  ;;  %v237_v55 = vadd.s32 128, %v2750_v22 }
   0x5   :  { %2322 = vmatprep.subr.bf16.mxu0 %v2355_v6  ;;  %v2358_v13 = vld [vmem:[%s3535_s1 + $0x20] sm:$0xff]   ;;  %v2359_v15 = vld [vmem:[%s3535_s1 + $0x28] sm:$0xff]   ;;  %v2360_v17 = vld [vmem:[%s3535_s1 + $0x30] sm:$0xff]   ;;  %v242_v57 = vand.u32 63, %v2750_v22 }
   0x6   :  { %62 = vperm.xlu1 %2353, %v45_v3   ;;  %56 = vperm.xlu0 %2352, %v43_v4   ;;  %v2364_v14 = vld [vmem:[%s3536_s2 + $0x4] ss:$8 sps:$4 sm:$0xff]   ;;  %v2362_v16 = vld [vmem:[%s3536_s2] ss:$8 sps:$4 sm:$0xff]   ;;  %v2361_v18 = vld [vmem:[%s3535_s1 + $0x38] sm:$0xff]   ;;  %v249_v58 = vand.u32 63, %v237_v55 }
   0x7   :  { %2344 = vmatprep.subr.bf16.mxu1 %v2364_v14  ;;  %v2367_v30 = vld [vmem:[%s3536_s2 + $0x14] ss:$8 sps:$4 sm:$0xff]   ;;  %v2365_v31 = vld [vmem:[%s3536_s2 + $0x10] ss:$8 sps:$4 sm:$0xff]   ;;  %v276_v46 = vld [vmem:[%s3537_s4] sm:$0x3] }
   0x8   :  { %2323 = vmatpush3.bf16.msra.mxu0 %v2355_v6  ;;  %2346 = vmatpush1.bf16.msra.mxu1 %v2362_v16  ;;  %v281_v49 = vrot.slane %v276_v46, %v2775_v45  ;;  %v285_v51 = vrot.slane %v276_v46, %v2780_v47  ;;  %vm2798_vm13 = vcmp.lt.s32.totalorder %v242_v57, 32  ;;  %vm2806_vm14 = vcmp.lt.s32.totalorder %v249_v58, 32  ;;  %v2921_v44 = vld [vmem:[%s3538_s3 + $0x24] ss:$8 sps:$4 sm:$0xff]   ;;  %v2926_v46 = vld [vmem:[%s3538_s3 + $0x20] ss:$8 sps:$4 sm:$0xff]  }
   0x9   :  { %2324 = vmatprep.subr.bf16.mxu0 %v2356_v9  ;;  %2345 = vmatprep.subr.bf16.mxu1 %v2367_v30  ;;  %s2626_s1 = smov 64   ;;  %v2406_v6 = vld [vmem:[%s3542_s8 + $0x24] ss:$8 sps:$4 sm:$0xff]  }
   0xa   :  { %68 = vperm.xlu1 %2353, %v47_v7   ;;  %65 = vperm.xlu0 %2352, %v46_v8  }
   0xc   :  { %2325 = vmatpush3.bf16.msra.mxu0 %v2356_v9  ;;  %2347 = vmatpush1.bf16.msra.mxu1 %v2365_v31 }
   0xd   :  { %2326 = vmatprep.subr.bf16.mxu0 %v2357_v12 }
   0xe   :  { %74 = vperm.xlu1 %2353, %v49_v10   ;;  %71 = vperm.xlu0 %2352, %v48_v11  }
  0x10   :  { %2327 = vmatpush3.bf16.msra.mxu0 %v2357_v12 }
  0x11   :  { %2328 = vmatprep.subr.bf16.mxu0 %v2358_v13 }
  0x14   :  { %2329 = vmatpush3.bf16.msra.mxu0 %v2358_v13 }
  0x15   :  { %2330 = vmatprep.subr.bf16.mxu0 %v2359_v15 }
  0x18   :  { %2331 = vmatpush3.bf16.msra.mxu0 %v2359_v15 }
  0x19   :  { %2332 = vmatprep.subr.bf16.mxu0 %v2360_v17 }
  0x1c   :  { %2333 = vmatpush3.bf16.msra.mxu0 %v2360_v17 }
  0x1d   :  { %2334 = vmatprep.subr.bf16.mxu0 %v2361_v18 }
  0x20   :  { %2335 = vmatpush3.bf16.msra.mxu0 %v2361_v18 }
  0x21   :  { %321 = vmatprep.subr.bf16.mxu0 %v2364_v14 }
  0x81   :  { %v60_v20 = vpop.permute.xlu1 %59  ;;  %v54_v21 = vpop.permute.xlu0 %53 }
  0x82   :  { %vm78_vm0 = vcmp.eq.s32.totalorder %v60_v20, %v2750_v22  ;;  %vm76_vm3 = vcmp.eq.s32.totalorder %v54_v21, %v2750_v22 }
  0x85   :  { %v63_v23 = vpop.permute.xlu1 %62  ;;  %v57_v24 = vpop.permute.xlu0 %56 }
  0x86   :  { %vm79_vm1 = vcmp.eq.s32.totalorder %v63_v23, %v2750_v22  ;;  %vm77_vm2 = vcmp.eq.s32.totalorder %v57_v24, %v2750_v22 }
  0x87   :  { %vm2171_vm4 = vmpackc.low %vm79_vm1, %vm78_vm0  ;;  %vm462_vm0 = vcmask 523264  }
  0x88   :  { %vm2169_vm5 = vmpackc.low %vm77_vm2, %vm76_vm3 }
  0x89   :  { %2336 = vmatprep.mubr.msk.bf16.mxu0 %vm2169_vm5, %v2625_v25  ;;  %v69_v26 = vpop.permute.xlu1 %68  ;;  %v66_v27 = vpop.permute.xlu0 %65 }
  0x8a   :  { %vm81_vm6 = vcmp.eq.s32.totalorder %v69_v26, %v2750_v22  ;;  %2337 = vmatmul.mubr.msk.bf16.vlgmr.msra.gmra.mrb[0].mxu0 %vm2171_vm4, %v2625_v25  ;;  %vm80_vm7 = vcmp.eq.s32.totalorder %v66_v27, %v2750_v22 }
  0x8b   :  { %vm2173_vm8 = vmpackc.low %vm81_vm6, %vm80_vm7  ;;  %322 = vmatpush1.bf16.msra.mxu0 %v2362_v16 }
  0x8c   :  { %2340 = vmatprep.mubr.msk.bf16.mxu0 %vm2173_vm8, %v2625_v25  ;;  %323 = vmatprep.subr.bf16.mxu0 %v2367_v30 }
  0x8d   :  { %v75_v28 = vpop.permute.xlu1 %74  ;;  %v72_v29 = vpop.permute.xlu0 %71 }
  0x8e   :  { %vm83_vm9 = vcmp.eq.s32.totalorder %v75_v28, %v2750_v22  ;;  %vm82_vm10 = vcmp.eq.s32.totalorder %v72_v29, %v2750_v22 }
  0x8f   :  { %vm2175_vm11 = vmpackc.low %vm83_vm9, %vm82_vm10  ;;  %324 = vmatpush1.bf16.msra.mxu0 %v2365_v31 }
  0x92   :  { %2341 = vmatmul.mubr.msk.bf16.gmra.mrb[4].mxu0 %vm2175_vm11, %v2625_v25 }
  0x93   :  { %353 = vmatprep.mubr.bf16.mxu0 %v2624_v0 }
 0x15d   :  { %v2338_v32 = vpop.f32.mrb[0].mxu0 }
 0x15e   :  { %v202_v33 = vpop.f32.mrb[1].mxu0 }
 0x15f   :  { %v2339_v34 = vpop.f32.mrb[2].mxu0 }
 0x160   :  { %v234_v35 = vpack.c.bf16 %v2339_v34, %v2338_v32  ;;  %v205_v36 = vpop.f32.mrb[3].mxu0  ;;  %v2869_v34 = vld [vmem:[%s3538_s3 + $0x4] ss:$8 sps:$4 sm:$0xff]  }
 0x161   :  { %v233_v37 = vpack.c.bf16 %v205_v36, %v202_v33  ;;  %466 = vmatprep.subr.bf16.mxu1 %v2869_v34  ;;  %551 = vmatprep.subr.bf16.mxu0 %v2869_v34 }
 0x163   :  { %2181 = vmatmul.mubr.msk.bf16.vlgmr.msra.gmra.mrb[8].mxu0 %vm308_vm12, %v233_v37 }
 0x164   :  { %363 = vmatprep.mubr.bf16.mxu0 %v2624_v0 }
 0x165   :  { %v2342_v38 = vpop.f32.mrb[4].mxu0 }
 0x166   :  { %v218_v39 = vpop.f32.mrb[5].mxu0 }
 0x167   :  { %v2343_v40 = vpop.f32.mrb[6].mxu0 }
 0x168   :  { %v236_v41 = vpack.c.bf16 %v2343_v40, %v2342_v38  ;;  %v221_v42 = vpop.f32.mrb[7].mxu0  ;;  %v2886_v38 = vld [vmem:[%s3538_s3] ss:$8 sps:$4 sm:$0xff]  }
 0x169   :  { %v235_v43 = vpack.c.bf16 %v221_v42, %v218_v39  ;;  %552 = vmatpush1.bf16.msra.mxu0 %v2886_v38  ;;  %v2907_v42 = vld [vmem:[%s3538_s3 + $0x14] ss:$8 sps:$4 sm:$0xff]  }
 0x16a   :  { %553 = vmatprep.subr.bf16.mxu0 %v2907_v42 }
 0x16b   :  { %2182 = vmatmul.mubr.msk.bf16.gmra.mrb[12].mxu0 %vm308_vm12, %v234_v35  ;;  %2183 = vmatmul.mubr.msk.bf16.vlgmr.msra.gmra.mrb[0].mxu1 %vm308_vm12, %v235_v43  ;;  %v2912_v43 = vld [vmem:[%s3538_s3 + $0x10] ss:$8 sps:$4 sm:$0xff]  }
 0x16c   :  { %383 = vmatprep.mubr.bf16.mxu1 %v2624_v0  ;;  %583 = vmatprep.mubr.bf16.mxu0 %v2624_v0 }
 0x16d   :  { %467 = vmatpush1.bf16.msra.mxu1 %v2886_v38  ;;  %554 = vmatpush1.bf16.msra.mxu0 %v2912_v43 }
 0x16e   :  { %468 = vmatprep.subr.bf16.mxu1 %v2907_v42  ;;  %555 = vmatprep.subr.bf16.mxu0 %v2921_v44 }
 0x171   :  { %469 = vmatpush1.bf16.msra.mxu1 %v2912_v43  ;;  %556 = vmatpush1.bf16.msra.mxu0 %v2926_v46 }
 0x172   :  { %470 = vmatprep.subr.bf16.mxu1 %v2921_v44 }
 0x173   :  { %2184 = vmatmul.mubr.msk.bf16.gmra.mrb[4].mxu1 %vm308_vm12, %v236_v41 }
 0x174   :  { %498 = vmatprep.mubr.bf16.mxu1 %v2624_v0 }
 0x175   :  { %471 = vmatpush1.bf16.msra.mxu1 %v2926_v46 }
 0x236   :  { %v355_v48 = vpop.f32.mrb[8].mxu0 }
 0x237   :  { %v357_v50 = vpop.f32.mrb[9].mxu0  ;;  %v2850_v27 = vadd.f32 %v355_v48, %v281_v49  ;;  %v2935_v48 = vld [vmem:[%s3538_s3 + $0x34] ss:$8 sps:$4 sm:$0xff]  }
 0x238   :  { %v359_v52 = vpop.f32.mrb[10].mxu0  ;;  %v2862_v32 = vadd.f32 %v357_v50, %v285_v51  ;;  %v2940_v50 = vld [vmem:[%s3538_s3 + $0x30] ss:$8 sps:$4 sm:$0xff]   ;;  %472 = vmatprep.subr.bf16.mxu1 %v2935_v48  ;;  %557 = vmatprep.subr.bf16.mxu0 %v2935_v48 }
 0x239   :  { %v2784_v53 = vadd.f32 %v359_v52, %v281_v49  ;;  %v361_v54 = vpop.f32.mrb[11].mxu0  ;;  %473 = vmatpush1.bf16.msra.mxu1 %v2940_v50  ;;  %558 = vmatpush1.bf16.msra.mxu0 %v2940_v50 }
 0x23a   :  { %v2787_v56 = vadd.f32 %v361_v54, %v285_v51  ;;  %632 = vmatprep.subr.bf16.mxu1 %v2869_v34  ;;  %713 = vmatprep.subr.bf16.mxu0 %v2869_v34 }
 0x23e   :  { %v365_v59 = vpop.f32.mrb[12].mxu0  ;;  %v375_v60 = vpop.f32.mrb[0].mxu1 }
 0x23f   :  { %v2790_v61 = vadd.f32 %v365_v59, %v281_v49  ;;  %v2792_v62 = vadd.f32 %v375_v60, %v281_v49  ;;  %v367_v63 = vpop.f32.mrb[13].mxu0  ;;  %v377_v1 = vpop.f32.mrb[1].mxu1 }
 0x240   :  { %v2794_v2 = vadd.f32 %v367_v63, %v285_v51  ;;  %v2796_v3 = vadd.f32 %v377_v1, %v285_v51  ;;  %v369_v4 = vpop.f32.mrb[14].mxu0  ;;  %v379_v5 = vpop.f32.mrb[2].mxu1 }
 0x241   :  { %v2802_v7 = vadd.f32 %v369_v4, %v281_v49  ;;  %v2804_v8 = vadd.f32 %v379_v5, %v281_v49  ;;  %v371_v9 = vpop.f32.mrb[15].mxu0  ;;  %v381_v10 = vpop.f32.mrb[3].mxu1 }
 0x242   :  { %v2810_v12 = vadd.f32 %v371_v9, %v285_v51  ;;  %v2812_v13 = vadd.f32 %v381_v10, %v285_v51 }
 0x243   :  { %v545_v14 = vsel %vm2798_vm13, %v2790_v61, %v2804_v8  ;;  %v626_v15 = vsel %vm2798_vm13, %v2802_v7, %v2792_v62  ;;  %v707_v16 = vsel %vm2798_vm13, %v2792_v62, %v2802_v7  ;;  %v788_v17 = vsel %vm2798_vm13, %v2804_v8, %v2790_v61 }
 0x244   :  { %v546_v18 = vsel %vm2806_vm14, %v2794_v2, %v2812_v13  ;;  %v627_v19 = vsel %vm2806_vm14, %v2810_v12, %v2796_v3  ;;  %v708_v20 = vsel %vm2806_vm14, %v2796_v3, %v2810_v12  ;;  %v789_v21 = vsel %vm2806_vm14, %v2812_v13, %v2794_v2 }
 0x246   :  { %v385_v22 = vpop.f32.mrb[4].mxu1 }
 0x247   :  { %v2846_v23 = vadd.f32 %v385_v22, %v281_v49  ;;  %v387_v24 = vpop.f32.mrb[5].mxu1 }
 0x248   :  { %v2848_v25 = vadd.f32 %v387_v24, %v285_v51  ;;  %v389_v26 = vpop.f32.mrb[6].mxu1 }
 0x249   :  { %v2852_v28 = vadd.f32 %v389_v26, %v281_v49  ;;  %v391_v29 = vpop.f32.mrb[7].mxu1  ;;  %v419_v30 = vsel %vm2798_vm13, %v2784_v53, %v2846_v23  ;;  %v869_v31 = vsel %vm2798_vm13, %v2846_v23, %v2784_v53 }
 0x24a   :  { %v2864_v33 = vadd.f32 %v391_v29, %v285_v51  ;;  %v420_v35 = vsel %vm2806_vm14, %v2787_v56, %v2848_v25  ;;  %v870_v36 = vsel %vm2806_vm14, %v2848_v25, %v2787_v56 }
 0x24b   :  { %v394_v37 = vsel %vm2798_vm13, %v2850_v27, %v2852_v28  ;;  %v950_v39 = vsel %vm2798_vm13, %v2852_v28, %v2850_v27 }
 0x24c   :  { %v395_v40 = vsel %vm2806_vm14, %v2862_v32, %v2864_v33  ;;  %v951_v41 = vsel %vm2806_vm14, %v2864_v33, %v2862_v32  ;;  %v2185_v51 = vmul.f32 -1.442695, %v394_v37  ;;  %v2380_v32 = vld [vmem:[%s3539_s5] ss:$8 sps:$4 sm:$0xff]   ;;  %v2382_v33 = vld [vmem:[%s3539_s5 + $0x4] ss:$8 sps:$4 sm:$0xff]  }
 0x24d   :  { %2432 = vtanh.f32 %v395_v40  ;;  %v2186_v52 = vmul.f32 -1.442695, %v395_v40 }
 0x24e   :  { %2434 = vpow2.f32 %v2185_v51 }
 0x24f   :  { %2436 = vpow2.f32 %v2186_v52 }
 0x257   :  { %v2433_v49 = vpop.eup %2432 }
 0x258   :  { %410 = vrot.lane.b32.xlu0 %v2433_v49, %s2626_s1  ;;  %v2435_v54 = vpop.eup %2434 }
 0x259   :  { %v402_v55 = vadd.f32 1.0, %v2435_v54  ;;  %v2437_v57 = vpop.eup %2436 }
 0x25a   :  { %v403_v58 = vadd.f32 1.0, %v2437_v57 }
 0x25b   :  { %2438 = vrcp.f32 %v402_v55 }
 0x25c   :  { %2440 = vrcp.f32 %v403_v58 }
 0x265   :  { %v2439_v59 = vpop.eup %2438 }
 0x266   :  { %v2441_v1 = vpop.eup %2440 }
 0x2ca   :  { %v411_v60 = vpop.permute.xlu0 %410 }
 0x2cb   :  { %v413_v63 = vmul.f32 %v2439_v59, %v411_v60 }
 0x2cd   :  { %2442 = vtanh.f32 %v413_v63  ;;  %523 = vrot.lane.b32.xlu0 %v413_v63, %s2626_s1 }
 0x2d7   :  { %v2443_v4 = vpop.eup %2442 }
 0x2d8   :  { %v415_v5 = vmul.f32 %v2443_v4, %v2441_v1 }
 0x2da   :  { %416 = vst.msk [vmem:[#allocation2] sm:$0xff] %vm308_vm12, %v415_v5  ;;  %v421_v9 = vpack.c.bf16 %v415_v5, %v415_v5 }
 0x2db   :  { %418 = vst.msk [vmem:[#allocation2 + $0x38] sm:$0xff] %vm417_vm15, %v415_v5 }
 0x2dc   :  { %2195 = vmatmul.mubr.msk.bf16.vlgmr.msra.gmra.mrb[8].mxu1 %vm462_vm0, %v421_v9 }
 0x2dd   :  { %633 = vmatpush1.bf16.msra.mxu1 %v2886_v38  ;;  %664 = vmatprep.mubr.bf16.mxu1 %v2624_v0 }
 0x2de   :  { %634 = vmatprep.subr.bf16.mxu1 %v2907_v42 }
 0x2e1   :  { %635 = vmatpush1.bf16.msra.mxu1 %v2912_v43 }
 0x2e2   :  { %636 = vmatprep.subr.bf16.mxu1 %v2921_v44 }
 0x2e5   :  { %637 = vmatpush1.bf16.msra.mxu1 %v2926_v46 }
 0x2e6   :  { %638 = vmatprep.subr.bf16.mxu1 %v2935_v48 }
 0x2e9   :  { %639 = vmatpush1.bf16.msra.mxu1 %v2940_v50 }
 0x2ea   :  { %794 = vmatprep.subr.bf16.mxu1 %v2869_v34 }
 0x33f   :  { %v524_v57 = vpop.permute.xlu0 %523 }
 0x3af   :  { %v500_v10 = vpop.f32.mrb[8].mxu1 }
 0x3b0   :  { %v507_v22 = vadd.f32 %v500_v10, %v419_v30  ;;  %v502_v24 = vpop.f32.mrb[9].mxu1 }
 0x3b1   :  { %v508_v26 = vadd.f32 %v502_v24, %v420_v35  ;;  %v504_v29 = vpop.f32.mrb[10].mxu1 }
 0x3b2   :  { %v505_v37 = vpop.f32.mrb[11].mxu1  ;;  %v2196_v49 = vmul.f32 -1.442695, %v507_v22 }
 0x3b3   :  { %2444 = vtanh.f32 %v508_v26  ;;  %v2197_v63 = vmul.f32 -1.442695, %v508_v26 }
 0x3b4   :  { %2446 = vpow2.f32 %v2196_v49 }
 0x3bd   :  { %v2445_v40 = vpop.eup %2444 }
 0x3be   :  { %528 = vrot.lane.b32.xlu1 %v2445_v40, %s2626_s1  ;;  %v2447_v51 = vpop.eup %2446 }
 0x3bf   :  { %v515_v52 = vadd.f32 1.0, %v2447_v51 }
 0x3c1   :  { %2448 = vrcp.f32 %v515_v52 }
 0x3cb   :  { %v2449_v54 = vpop.eup %2448 }
 0x3cc   :  { %v526_v58 = vmul.f32 %v2449_v54, %v524_v57 }
 0x430   :  { %v529_v30 = vpop.permute.xlu1 %528 }
 0x431   :  { %v531_v55 = vmul.f32 %v2449_v54, %v529_v30 }
 0x433   :  { %533 = vrot.lane.b32.xlu1 %v531_v55, %s2626_s1 }
 0x4a5   :  { %v534_v59 = vpop.permute.xlu1 %533 }
 0x4a6   :  { %v536_v35 = vadd.f32 %v534_v59, %v526_v58 }
 0x4a8   :  { %2450 = vtanh.f32 %v536_v35 }
 0x4a9   :  { %2452 = vpow2.f32 %v2197_v63 }
 0x4b2   :  { %v2451_v60 = vpop.eup %2450 }
 0x4b3   :  { %539 = vrot.lane.b32.xlu0 %v2451_v60, %s2626_s1  ;;  %v2453_v1 = vpop.eup %2452 }
 0x4b4   :  { %v516_v4 = vadd.f32 1.0, %v2453_v1 }
 0x4b6   :  { %2454 = vrcp.f32 %v516_v4 }
 0x4c0   :  { %v2455_v5 = vpop.eup %2454 }
 0x525   :  { %v540_v9 = vpop.permute.xlu0 %539 }
 0x526   :  { %v542_v10 = vmul.f32 %v2455_v5, %v540_v9 }
 0x528   :  { %543 = vst.msk [vmem:[#allocation2 + $0x8] sm:$0xff] %vm308_vm12, %v542_v10  ;;  %v547_v22 = vpack.c.bf16 %v542_v10, %v542_v10 }
 0x529   :  { %544 = vst.msk [vmem:[#allocation2 + $0x30] sm:$0xff] %vm417_vm15, %v542_v10 }
 0x52a   :  { %2198 = vmatmul.mubr.msk.bf16.vlgmr.msra.gmra.mrb[16].mxu0 %vm462_vm0, %v547_v22 }
 0x52b   :  { %714 = vmatpush1.bf16.msra.mxu0 %v2886_v38  ;;  %745 = vmatprep.mubr.bf16.mxu0 %v2624_v0 }
 0x52c   :  { %715 = vmatprep.subr.bf16.mxu0 %v2907_v42 }
 0x52f   :  { %716 = vmatpush1.bf16.msra.mxu0 %v2912_v43 }
 0x530   :  { %717 = vmatprep.subr.bf16.mxu0 %v2921_v44 }
 0x533   :  { %718 = vmatpush1.bf16.msra.mxu0 %v2926_v46 }
 0x534   :  { %719 = vmatprep.subr.bf16.mxu0 %v2935_v48 }
 0x537   :  { %720 = vmatpush1.bf16.msra.mxu0 %v2940_v50 }
 0x538   :  { %875 = vmatprep.subr.bf16.mxu0 %v2869_v34 }
 0x5fd   :  { %v585_v24 = vpop.f32.mrb[16].mxu0 }
 0x5fe   :  { %v592_v26 = vadd.f32 %v585_v24, %v545_v14  ;;  %v587_v29 = vpop.f32.mrb[17].mxu0 }
 0x5ff   :  { %v593_v37 = vadd.f32 %v587_v29, %v546_v18  ;;  %v589_v40 = vpop.f32.mrb[18].mxu0 }
 0x600   :  { %v590_v49 = vpop.f32.mrb[19].mxu0  ;;  %v2199_v52 = vmul.f32 -1.442695, %v592_v26 }
 0x601   :  { %2456 = vtanh.f32 %v593_v37  ;;  %v2200_v63 = vmul.f32 -1.442695, %v593_v37 }
 0x602   :  { %2458 = vpow2.f32 %v2199_v52 }
 0x60b   :  { %v2457_v51 = vpop.eup %2456 }
 0x60c   :  { %609 = vrot.lane.b32.xlu1 %v2457_v51, %s2626_s1  ;;  %v2459_v54 = vpop.eup %2458 }
 0x60d   :  { %v600_v30 = vadd.f32 1.0, %v2459_v54 }
 0x60f   :  { %2460 = vrcp.f32 %v600_v30 }
 0x619   :  { %v2461_v55 = vpop.eup %2460 }
 0x61a   :  { %v607_v58 = vmul.f32 %v2461_v55, %v536_v35 }
 0x67e   :  { %v610_v14 = vpop.permute.xlu1 %609 }
 0x67f   :  { %v612_v57 = vmul.f32 %v2461_v55, %v610_v14 }
 0x681   :  { %614 = vrot.lane.b32.xlu0 %v612_v57, %s2626_s1 }
 0x6f3   :  { %v615_v59 = vpop.permute.xlu0 %614 }
 0x6f4   :  { %v617_v60 = vadd.f32 %v615_v59, %v607_v58 }
 0x6f6   :  { %2462 = vtanh.f32 %v617_v60 }
 0x6f7   :  { %2464 = vpow2.f32 %v2200_v63 }
 0x700   :  { %v2463_v18 = vpop.eup %2462 }
 0x701   :  { %620 = vrot.lane.b32.xlu1 %v2463_v18, %s2626_s1  ;;  %v2465_v1 = vpop.eup %2464 }
 0x702   :  { %v601_v4 = vadd.f32 1.0, %v2465_v1 }
 0x704   :  { %2466 = vrcp.f32 %v601_v4 }
 0x70e   :  { %v2467_v5 = vpop.eup %2466 }
 0x773   :  { %v621_v9 = vpop.permute.xlu1 %620 }
 0x774   :  { %v623_v10 = vmul.f32 %v2467_v5, %v621_v9 }
 0x776   :  { %624 = vst.msk [vmem:[#allocation2 + $0x10] sm:$0xff] %vm308_vm12, %v623_v10  ;;  %v628_v22 = vpack.c.bf16 %v623_v10, %v623_v10 }
 0x777   :  { %625 = vst.msk [vmem:[#allocation2 + $0x28] sm:$0xff] %vm417_vm15, %v623_v10 }
 0x778   :  { %2201 = vmatmul.mubr.msk.bf16.vlgmr.msra.gmra.mrb[12].mxu1 %vm462_vm0, %v628_v22 }
 0x779   :  { %795 = vmatpush1.bf16.msra.mxu1 %v2886_v38  ;;  %826 = vmatprep.mubr.bf16.mxu1 %v2624_v0 }
 0x77a   :  { %796 = vmatprep.subr.bf16.mxu1 %v2907_v42 }
 0x77d   :  { %797 = vmatpush1.bf16.msra.mxu1 %v2912_v43 }
 0x77e   :  { %798 = vmatprep.subr.bf16.mxu1 %v2921_v44 }
 0x781   :  { %799 = vmatpush1.bf16.msra.mxu1 %v2926_v46 }
 0x782   :  { %800 = vmatprep.subr.bf16.mxu1 %v2935_v48 }
 0x785   :  { %801 = vmatpush1.bf16.msra.mxu1 %v2940_v50 }
 0x786   :  { %956 = vmatprep.subr.bf16.mxu1 %v2869_v34 }
 0x84b   :  { %v666_v35 = vpop.f32.mrb[12].mxu1 }
 0x84c   :  { %v673_v24 = vadd.f32 %v666_v35, %v626_v15  ;;  %v668_v26 = vpop.f32.mrb[13].mxu1 }
 0x84d   :  { %v674_v29 = vadd.f32 %v668_v26, %v627_v19  ;;  %v670_v37 = vpop.f32.mrb[14].mxu1 }
 0x84e   :  { %v671_v40 = vpop.f32.mrb[15].mxu1  ;;  %v2202_v34 = vmul.f32 -1.442695, %v673_v24 }
 0x84f   :  { %2468 = vtanh.f32 %v674_v29  ;;  %v2203_v58 = vmul.f32 -1.442695, %v674_v29 }
 0x850   :  { %2470 = vpow2.f32 %v2202_v34 }
 0x859   :  { %v2469_v49 = vpop.eup %2468 }
 0x85a   :  { %690 = vrot.lane.b32.xlu0 %v2469_v49, %s2626_s1  ;;  %v2471_v51 = vpop.eup %2470 }
 0x85b   :  { %v681_v52 = vadd.f32 1.0, %v2471_v51 }
 0x85d   :  { %2472 = vrcp.f32 %v681_v52 }
 0x867   :  { %v2473_v54 = vpop.eup %2472 }
 0x868   :  { %v688_v55 = vmul.f32 %v2473_v54, %v617_v60 }
 0x8cc   :  { %v691_v15 = vpop.permute.xlu0 %690 }
 0x8cd   :  { %v693_v30 = vmul.f32 %v2473_v54, %v691_v15 }
 0x8cf   :  { %695 = vrot.lane.b32.xlu1 %v693_v30, %s2626_s1 }
 0x941   :  { %v696_v14 = vpop.permute.xlu1 %695 }
 0x942   :  { %v698_v57 = vadd.f32 %v696_v14, %v688_v55 }
 0x944   :  { %2474 = vtanh.f32 %v698_v57 }
 0x945   :  { %2476 = vpow2.f32 %v2203_v58 }
 0x94e   :  { %v2475_v19 = vpop.eup %2474 }
 0x94f   :  { %701 = vrot.lane.b32.xlu0 %v2475_v19, %s2626_s1  ;;  %v2477_v59 = vpop.eup %2476 }
 0x950   :  { %v682_v18 = vadd.f32 1.0, %v2477_v59 }
 0x952   :  { %2478 = vrcp.f32 %v682_v18 }
 0x95c   :  { %v2479_v63 = vpop.eup %2478 }
 0x9c1   :  { %v702_v1 = vpop.permute.xlu0 %701 }
 0x9c2   :  { %v704_v4 = vmul.f32 %v2479_v63, %v702_v1 }
 0x9c4   :  { %705 = vst.msk [vmem:[#allocation2 + $0x18] sm:$0xff] %vm308_vm12, %v704_v4  ;;  %v709_v5 = vpack.c.bf16 %v704_v4, %v704_v4 }
 0x9c5   :  { %706 = vst.msk [vmem:[#allocation2 + $0x20] sm:$0xff] %vm417_vm15, %v704_v4 }
 0x9c6   :  { %2204 = vmatmul.mubr.msk.bf16.vlgmr.msra.gmra.mrb[20].mxu0 %vm462_vm0, %v709_v5 }
 0x9c7   :  { %876 = vmatpush1.bf16.msra.mxu0 %v2886_v38  ;;  %907 = vmatprep.mubr.bf16.mxu0 %v2624_v0 }
 0x9c8   :  { %877 = vmatprep.subr.bf16.mxu0 %v2907_v42 }
 0x9cb   :  { %878 = vmatpush1.bf16.msra.mxu0 %v2912_v43 }
 0x9cc   :  { %879 = vmatprep.subr.bf16.mxu0 %v2921_v44 }
 0x9cf   :  { %880 = vmatpush1.bf16.msra.mxu0 %v2926_v46 }
 0x9d0   :  { %881 = vmatprep.subr.bf16.mxu0 %v2935_v48 }
 0x9d3   :  { %882 = vmatpush1.bf16.msra.mxu0 %v2940_v50 }
 0x9d4   :  { %1123 = vmatprep.subr.bf16.mxu0 %v2382_v33 }
 0xa99   :  { %v747_v60 = vpop.f32.mrb[20].mxu0 }
 0xa9a   :  { %v754_v9 = vadd.f32 %v747_v60, %v707_v16  ;;  %v749_v10 = vpop.f32.mrb[21].mxu0 }
 0xa9b   :  { %v755_v22 = vadd.f32 %v749_v10, %v708_v20  ;;  %v751_v35 = vpop.f32.mrb[22].mxu0 }
 0xa9c   :  { %v752_v24 = vpop.f32.mrb[23].mxu0  ;;  %v2205_v29 = vmul.f32 -1.442695, %v754_v9 }
 0xa9d   :  { %2480 = vtanh.f32 %v755_v22  ;;  %v2206_v20 = vmul.f32 -1.442695, %v755_v22 }
 0xa9e   :  { %2482 = vpow2.f32 %v2205_v29 }
 0xaa7   :  { %v2481_v26 = vpop.eup %2480 }
 0xaa8   :  { %771 = vrot.lane.b32.xlu1 %v2481_v26, %s2626_s1  ;;  %v2483_v37 = vpop.eup %2482 }
 0xaa9   :  { %v762_v40 = vadd.f32 1.0, %v2483_v37 }
 0xaab   :  { %2484 = vrcp.f32 %v762_v40 }
 0xab5   :  { %v2485_v62 = vpop.eup %2484 }
 0xab6   :  { %v769_v49 = vmul.f32 %v2485_v62, %v698_v57 }
 0xb1a   :  { %v772_v7 = vpop.permute.xlu1 %771 }
 0xb1b   :  { %v774_v16 = vmul.f32 %v2485_v62, %v772_v7 }
 0xb1d   :  { %776 = vrot.lane.b32.xlu0 %v774_v16, %s2626_s1 }
 0xb8f   :  { %v777_v34 = vpop.permute.xlu0 %776 }
 0xb90   :  { %v779_v3 = vadd.f32 %v777_v34, %v769_v49 }
 0xb92   :  { %2486 = vtanh.f32 %v779_v3 }
 0xb93   :  { %2488 = vpow2.f32 %v2206_v20 }
 0xb9c   :  { %v2487_v12 = vpop.eup %2486 }
 0xb9d   :  { %782 = vrot.lane.b32.xlu1 %v2487_v12, %s2626_s1  ;;  %v2489_v51 = vpop.eup %2488 }
 0xb9e   :  { %v763_v52 = vadd.f32 1.0, %v2489_v51 }
 0xba0   :  { %2490 = vrcp.f32 %v763_v52 }
 0xbaa   :  { %v2491_v54 = vpop.eup %2490 }
 0xc0f   :  { %v783_v15 = vpop.permute.xlu1 %782 }
 0xc10   :  { %v785_v30 = vmul.f32 %v2491_v54, %v783_v15 }
 0xc12   :  { %786 = vst.msk [vmem:[#allocation2 + $0x20] sm:$0xff] %vm308_vm12, %v785_v30  ;;  %v790_v55 = vpack.c.bf16 %v785_v30, %v785_v30 }
 0xc13   :  { %787 = vst.msk [vmem:[#allocation2 + $0x18] sm:$0xff] %vm417_vm15, %v785_v30 }
 0xc14   :  { %2207 = vmatmul.mubr.msk.bf16.vlgmr.msra.gmra.mrb[16].mxu1 %vm462_vm0, %v790_v55 }
 0xc15   :  { %957 = vmatpush1.bf16.msra.mxu1 %v2886_v38  ;;  %988 = vmatprep.mubr.bf16.mxu1 %v2624_v0 }
 0xc16   :  { %958 = vmatprep.subr.bf16.mxu1 %v2907_v42 }
 0xc19   :  { %959 = vmatpush1.bf16.msra.mxu1 %v2912_v43 }
 0xc1a   :  { %960 = vmatprep.subr.bf16.mxu1 %v2921_v44 }
 0xc1d   :  { %961 = vmatpush1.bf16.msra.mxu1 %v2926_v46 }
 0xc1e   :  { %962 = vmatprep.subr.bf16.mxu1 %v2935_v48 }
 0xc21   :  { %963 = vmatpush1.bf16.msra.mxu1 %v2940_v50 }
 0xce7   :  { %v828_v14 = vpop.f32.mrb[16].mxu1 }
 0xce8   :  { %v835_v38 = vadd.f32 %v828_v14, %v788_v17  ;;  %v830_v57 = vpop.f32.mrb[17].mxu1 }
 0xce9   :  { %v836_v42 = vadd.f32 %v830_v57, %v789_v21  ;;  %v832_v43 = vpop.f32.mrb[18].mxu1 }
 0xcea   :  { %v833_v44 = vpop.f32.mrb[19].mxu1  ;;  %v2208_v48 = vmul.f32 -1.442695, %v835_v38 }
 0xceb   :  { %2492 = vtanh.f32 %v836_v42  ;;  %v2209_v21 = vmul.f32 -1.442695, %v836_v42  ;;  %v2385_v44 = vld [vmem:[%s3539_s5 + $0x14] ss:$8 sps:$4 sm:$0xff]  }
 0xcec   :  { %2494 = vpow2.f32 %v2208_v48  ;;  %v2383_v48 = vld [vmem:[%s3539_s5 + $0x10] ss:$8 sps:$4 sm:$0xff]  }
 0xcf5   :  { %v2493_v46 = vpop.eup %2492 }
 0xcf6   :  { %852 = vrot.lane.b32.xlu0 %v2493_v46, %s2626_s1  ;;  %v2495_v50 = vpop.eup %2494 }
 0xcf7   :  { %v843_v19 = vadd.f32 1.0, %v2495_v50 }
 0xcf9   :  { %2496 = vrcp.f32 %v843_v19  ;;  %v2386_v19 = vld [vmem:[%s3539_s5 + $0x20] ss:$8 sps:$4 sm:$0xff]  }
 0xd03   :  { %v2497_v61 = vpop.eup %2496 }
 0xd04   :  { %v850_v58 = vmul.f32 %v2497_v61, %v779_v3 }
 0xd68   :  { %v853_v8 = vpop.permute.xlu0 %852 }
 0xd69   :  { %v855_v17 = vmul.f32 %v2497_v61, %v853_v8  ;;  %v2388_v61 = vld [vmem:[%s3539_s5 + $0x24] ss:$8 sps:$4 sm:$0xff]   ;;  %v2391_v8 = vld [vmem:[%s3539_s5 + $0x34] ss:$8 sps:$4 sm:$0xff]  }
 0xd6b   :  { %857 = vrot.lane.b32.xlu1 %v855_v17, %s2626_s1  ;;  %v2389_v17 = vld [vmem:[%s3539_s5 + $0x30] ss:$8 sps:$4 sm:$0xff]  }
 0xddd   :  { %v858_v59 = vpop.permute.xlu1 %857 }
 0xdde   :  { %v860_v2 = vadd.f32 %v858_v59, %v850_v58 }
 0xde0   :  { %2498 = vtanh.f32 %v860_v2 }
 0xde1   :  { %2500 = vpow2.f32 %v2209_v21 }
 0xdea   :  { %v2499_v13 = vpop.eup %2498 }
 0xdeb   :  { %863 = vrot.lane.b32.xlu0 %v2499_v13, %s2626_s1  ;;  %v2501_v18 = vpop.eup %2500 }
 0xdec   :  { %v844_v63 = vadd.f32 1.0, %v2501_v18 }
 0xdee   :  { %2502 = vrcp.f32 %v844_v63 }
 0xdf8   :  { %v2503_v1 = vpop.eup %2502 }
 0xe5d   :  { %v864_v4 = vpop.permute.xlu0 %863 }
 0xe5e   :  { %v866_v5 = vmul.f32 %v2503_v1, %v864_v4 }
 0xe60   :  { %867 = vst.msk [vmem:[#allocation2 + $0x28] sm:$0xff] %vm308_vm12, %v866_v5  ;;  %v871_v60 = vpack.c.bf16 %v866_v5, %v866_v5 }
 0xe61   :  { %868 = vst.msk [vmem:[#allocation2 + $0x10] sm:$0xff] %vm417_vm15, %v866_v5 }
 0xe62   :  { %2210 = vmatmul.mubr.msk.bf16.vlgmr.msra.gmra.mrb[24].mxu0 %vm462_vm0, %v871_v60 }
 0xe63   :  { %1155 = vmatprep.mubr.bf16.mxu0 %v2624_v0  ;;  %1124 = vmatpush1.bf16.msra.mxu0 %v2380_v32 }
 0xe64   :  { %1125 = vmatprep.subr.bf16.mxu0 %v2385_v44 }
 0xe67   :  { %1126 = vmatpush1.bf16.msra.mxu0 %v2383_v48 }
 0xe68   :  { %1127 = vmatprep.subr.bf16.mxu0 %v2388_v61  ;;  %v1033_v60 = vld [vmem:[#allocation2 + $0x10] sm:$0xff] }
 0xe6b   :  { %1128 = vmatpush1.bf16.msra.mxu0 %v2386_v19 }
 0xe6c   :  { %1129 = vmatprep.subr.bf16.mxu0 %v2391_v8 }
 0xe6f   :  { %1130 = vmatpush1.bf16.msra.mxu0 %v2389_v17 }
 0xf35   :  { %v909_v9 = vpop.f32.mrb[24].mxu0 }
 0xf36   :  { %v916_v10 = vadd.f32 %v909_v9, %v869_v31  ;;  %v911_v22 = vpop.f32.mrb[25].mxu0  ;;  %v1034_v9 = vld [vmem:[#allocation2 + $0x18] sm:$0xff] }
 0xf37   :  { %v917_v35 = vadd.f32 %v911_v22, %v870_v36  ;;  %v913_v24 = vpop.f32.mrb[26].mxu0  ;;  %v1036_v22 = vld [vmem:[#allocation2 + $0x28] sm:$0xff] }
 0xf38   :  { %v914_v26 = vpop.f32.mrb[27].mxu0  ;;  %v2211_v37 = vmul.f32 -1.442695, %v916_v10  ;;  %v1040_v10 = vpack.c.bf16 %v1034_v9, %v1033_v60 }
 0xf39   :  { %2504 = vtanh.f32 %v917_v35  ;;  %v2212_v36 = vmul.f32 -1.442695, %v917_v35  ;;  %v1035_v35 = vld [vmem:[#allocation2 + $0x20] sm:$0xff] }
 0xf3a   :  { %2506 = vpow2.f32 %v2211_v37  ;;  %v1041_v24 = vpack.c.bf16 %v1036_v22, %v1035_v35  ;;  %v3258_v22 = vld [vmem:[%s3541_s6 + $0x14] ss:$8 sps:$4 sm:$0xff]   ;;  %v3263_v35 = vld [vmem:[%s3541_s6 + $0x10] ss:$8 sps:$4 sm:$0xff]  }
 0xf43   :  { %v2505_v29 = vpop.eup %2504 }
 0xf44   :  { %933 = vrot.lane.b32.xlu1 %v2505_v29, %s2626_s1  ;;  %v2507_v40 = vpop.eup %2506 }
 0xf45   :  { %v924_v62 = vadd.f32 1.0, %v2507_v40  ;;  %v1059_v40 = vld [vmem:[%s3540_s7] sm:$0x3] }
 0xf47   :  { %2508 = vrcp.f32 %v924_v62 }
 0xf51   :  { %v2509_v53 = vpop.eup %2508 }
 0xf52   :  { %v931_v7 = vmul.f32 %v2509_v53, %v860_v2 }
 0xfb6   :  { %v934_v23 = vpop.permute.xlu1 %933 }
 0xfb7   :  { %v936_v31 = vmul.f32 %v2509_v53, %v934_v23  ;;  %v1064_v53 = vrot.slane %v1059_v40, %v2775_v45 }
 0xfb9   :  { %938 = vrot.lane.b32.xlu0 %v936_v31, %s2626_s1  ;;  %v1068_v31 = vrot.slane %v1059_v40, %v2780_v47 }
0x102b   :  { %v939_v16 = vpop.permute.xlu0 %938 }
0x102c   :  { %v941_v56 = vadd.f32 %v939_v16, %v931_v7 }
0x102e   :  { %2510 = vtanh.f32 %v941_v56 }
0x102f   :  { %2512 = vpow2.f32 %v2212_v36 }
0x1038   :  { %v2511_v25 = vpop.eup %2510 }
0x1039   :  { %944 = vrot.lane.b32.xlu1 %v2511_v25, %s2626_s1  ;;  %v2513_v49 = vpop.eup %2512 }
0x103a   :  { %v925_v34 = vadd.f32 1.0, %v2513_v49 }
0x103c   :  { %2514 = vrcp.f32 %v925_v34 }
0x1046   :  { %v2515_v3 = vpop.eup %2514 }
0x10ab   :  { %v945_v12 = vpop.permute.xlu1 %944 }
0x10ac   :  { %v947_v20 = vmul.f32 %v2515_v3, %v945_v12 }
0x10ae   :  { %948 = vst.msk [vmem:[#allocation2 + $0x30] sm:$0xff] %vm308_vm12, %v947_v20  ;;  %v952_v51 = vpack.c.bf16 %v947_v20, %v947_v20 }
0x10af   :  { %949 = vst.msk [vmem:[#allocation2 + $0x8] sm:$0xff] %vm417_vm15, %v947_v20 }
0x10b0   :  { %2213 = vmatmul.mubr.msk.bf16.vlgmr.msra.gmra.mrb[20].mxu1 %vm462_vm0, %v952_v51 }
0x10b1   :  { %1296 = vmatprep.mubr.bf16.mxu1 %v2624_v0 }
0x10b5   :  { %v1037_v29 = vld [vmem:[#allocation2 + $0x30] sm:$0xff] }
0x10b6   :  { %v1032_v4 = vld [vmem:[#allocation2 + $0x8] sm:$0xff] }
0x1183   :  { %v990_v52 = vpop.f32.mrb[20].mxu1 }
0x1184   :  { %v997_v54 = vadd.f32 %v990_v52, %v950_v39  ;;  %v992_v15 = vpop.f32.mrb[21].mxu1 }
0x1185   :  { %v998_v30 = vadd.f32 %v992_v15, %v951_v41  ;;  %v994_v55 = vpop.f32.mrb[22].mxu1 }
0x1186   :  { %v995_v14 = vpop.f32.mrb[23].mxu1  ;;  %v2214_v57 = vmul.f32 -1.442695, %v997_v54 }
0x1187   :  { %2516 = vtanh.f32 %v998_v30  ;;  %v2215_v59 = vmul.f32 -1.442695, %v998_v30 }
0x1188   :  { %2518 = vpow2.f32 %v2214_v57 }
0x1191   :  { %v2517_v38 = vpop.eup %2516 }
0x1192   :  { %1014 = vrot.lane.b32.xlu0 %v2517_v38, %s2626_s1  ;;  %v2519_v42 = vpop.eup %2518 }
0x1193   :  { %v1005_v43 = vadd.f32 1.0, %v2519_v42 }
0x1195   :  { %2520 = vrcp.f32 %v1005_v43 }
0x119f   :  { %v2521_v27 = vpop.eup %2520 }
0x11a0   :  { %v1012_v41 = vmul.f32 %v2521_v27, %v941_v56 }
0x1204   :  { %v1015_v28 = vpop.permute.xlu0 %1014 }
0x1205   :  { %v1017_v39 = vmul.f32 %v2521_v27, %v1015_v28 }
0x1207   :  { %1019 = vrot.lane.b32.xlu1 %v1017_v39, %s2626_s1 }
0x1279   :  { %v1020_v46 = vpop.permute.xlu1 %1019 }
0x127a   :  { %v1022_v50 = vadd.f32 %v1020_v46, %v1012_v41 }
0x127c   :  { %2522 = vtanh.f32 %v1022_v50 }
0x127d   :  { %2524 = vpow2.f32 %v2215_v59 }
0x1286   :  { %v2523_v58 = vpop.eup %2522 }
0x1287   :  { %1025 = vrot.lane.b32.xlu0 %v2523_v58, %s2626_s1  ;;  %v2525_v2 = vpop.eup %2524 }
0x1288   :  { %v1006_v13 = vadd.f32 1.0, %v2525_v2 }
0x128a   :  { %2526 = vrcp.f32 %v1006_v13 }
0x1294   :  { %v2527_v21 = vpop.eup %2526 }
0x12f9   :  { %v1026_v18 = vpop.permute.xlu0 %1025 }
0x12fa   :  { %v1028_v63 = vmul.f32 %v2527_v21, %v1026_v18  ;;  %v3221_v18 = vld [vmem:[%s3541_s6 + $0x4] ss:$8 sps:$4 sm:$0xff]  }
0x12fb   :  { %1264 = vmatprep.subr.bf16.mxu1 %v3221_v18  ;;  %1426 = vmatprep.subr.bf16.mxu0 %v3221_v18 }
0x12fc   :  { %1029 = vst.msk [vmem:[#allocation2 + $0x38] sm:$0xff] %vm308_vm12, %v1028_v63 }
0x12fd   :  { %1030 = vst.msk [vmem:[#allocation2] sm:$0xff] %vm417_vm15, %v1028_v63 }
0x1303   :  { %v1038_v26 = vld [vmem:[#allocation2 + $0x38] sm:$0xff] }
0x1304   :  { %v1031_v1 = vld [vmem:[#allocation2] sm:$0xff]  ;;  %v1042_v37 = vpack.c.bf16 %v1038_v26, %v1037_v29  ;;  %v3284_v29 = vld [vmem:[%s3541_s6 + $0x34] ss:$8 sps:$4 sm:$0xff]  }
0x1305   :  { %v1039_v5 = vpack.c.bf16 %v1032_v4, %v1031_v1  ;;  %v3277_v26 = vld [vmem:[%s3541_s6 + $0x20] ss:$8 sps:$4 sm:$0xff]  }
0x1307   :  { %2224 = vmatmul.mubr.msk.bf16.vlgmr.msra.gmra.mrb[28].mxu0 %vm462_vm0, %v1039_v5  ;;  %v3238_v5 = vld [vmem:[%s3541_s6] ss:$8 sps:$4 sm:$0xff]  }
0x1308   :  { %1165 = vmatprep.mubr.bf16.mxu0 %v2624_v0  ;;  %1265 = vmatpush1.bf16.msra.mxu1 %v3238_v5 }
0x1309   :  { %1427 = vmatpush1.bf16.msra.mxu0 %v3238_v5  ;;  %1266 = vmatprep.subr.bf16.mxu1 %v3258_v22 }
0x130a   :  { %1428 = vmatprep.subr.bf16.mxu0 %v3258_v22 }
0x130c   :  { %1267 = vmatpush1.bf16.msra.mxu1 %v3263_v35 }
0x130d   :  { %1429 = vmatpush1.bf16.msra.mxu0 %v3263_v35 }
0x130f   :  { %2225 = vmatmul.mubr.msk.bf16.gmra.mrb[32].mxu0 %vm462_vm0, %v1040_v10 }
0x1310   :  { %1175 = vmatprep.mubr.bf16.mxu0 %v2624_v0 }
0x1317   :  { %2226 = vmatmul.mubr.msk.bf16.gmra.mrb[36].mxu0 %vm462_vm0, %v1041_v24  ;;  %v3269_v24 = vld [vmem:[%s3541_s6 + $0x24] ss:$8 sps:$4 sm:$0xff]  }
0x1318   :  { %1185 = vmatprep.mubr.bf16.mxu0 %v2624_v0  ;;  %1268 = vmatprep.subr.bf16.mxu1 %v3269_v24 }
0x1319   :  { %1430 = vmatprep.subr.bf16.mxu0 %v3269_v24  ;;  %1269 = vmatpush1.bf16.msra.mxu1 %v3277_v26 }
0x131a   :  { %1431 = vmatpush1.bf16.msra.mxu0 %v3277_v26  ;;  %1270 = vmatprep.subr.bf16.mxu1 %v3284_v29 }
0x131b   :  { %1432 = vmatprep.subr.bf16.mxu0 %v3284_v29 }
0x131f   :  { %2227 = vmatmul.mubr.msk.bf16.gmra.mrb[40].mxu0 %vm462_vm0, %v1042_v37  ;;  %v3291_v37 = vld [vmem:[%s3541_s6 + $0x30] ss:$8 sps:$4 sm:$0xff]  }
0x1320   :  { %1458 = vmatprep.mubr.bf16.mxu0 %v2624_v0  ;;  %1271 = vmatpush1.bf16.msra.mxu1 %v3291_v37 }
0x1321   :  { %1433 = vmatpush1.bf16.msra.mxu0 %v3291_v37  ;;  %1347 = vmatprep.subr.bf16.mxu1 %v3221_v18 }
0x1322   :  { %1584 = vmatprep.subr.bf16.mxu0 %v3221_v18 }
0x13da   :  { %v1157_v62 = vpop.f32.mrb[28].mxu0 }
0x13db   :  { %v1159_v23 = vpop.f32.mrb[29].mxu0  ;;  %v3202_v8 = vadd.f32 %v1157_v62, %v1064_v53 }
0x13dc   :  { %v1161_v7 = vpop.f32.mrb[30].mxu0  ;;  %v3214_v13 = vadd.f32 %v1159_v23, %v1068_v31 }
0x13dd   :  { %v3146_v16 = vadd.f32 %v1161_v7, %v1064_v53  ;;  %v1163_v56 = vpop.f32.mrb[31].mxu0 }
0x13de   :  { %v3148_v25 = vadd.f32 %v1163_v56, %v1068_v31 }
0x13e2   :  { %v1167_v36 = vpop.f32.mrb[32].mxu0 }
0x13e3   :  { %v3150_v49 = vadd.f32 %v1167_v36, %v1064_v53  ;;  %v1169_v34 = vpop.f32.mrb[33].mxu0 }
0x13e4   :  { %v3152_v3 = vadd.f32 %v1169_v34, %v1068_v31  ;;  %v1171_v12 = vpop.f32.mrb[34].mxu0 }
0x13e5   :  { %v3154_v20 = vadd.f32 %v1171_v12, %v1064_v53  ;;  %v1173_v51 = vpop.f32.mrb[35].mxu0 }
0x13e6   :  { %v3156_v52 = vadd.f32 %v1173_v51, %v1068_v31 }
0x13ea   :  { %v1177_v54 = vpop.f32.mrb[36].mxu0 }
0x13eb   :  { %v3158_v15 = vadd.f32 %v1177_v54, %v1064_v53  ;;  %v1179_v30 = vpop.f32.mrb[37].mxu0 }
0x13ec   :  { %v3160_v55 = vadd.f32 %v1179_v30, %v1068_v31  ;;  %v1181_v14 = vpop.f32.mrb[38].mxu0 }
0x13ed   :  { %v3162_v38 = vadd.f32 %v1181_v14, %v1064_v53  ;;  %v1183_v57 = vpop.f32.mrb[39].mxu0  ;;  %v1420_v42 = vsel %vm2798_vm13, %v3154_v20, %v3158_v15  ;;  %v1499_v43 = vsel %vm2798_vm13, %v3158_v15, %v3154_v20 }
0x13ee   :  { %v3172_v27 = vadd.f32 %v1183_v57, %v1068_v31  ;;  %v1421_v28 = vsel %vm2806_vm14, %v3156_v52, %v3160_v55  ;;  %v1500_v39 = vsel %vm2806_vm14, %v3160_v55, %v3156_v52 }
0x13ef   :  { %v1341_v32 = vsel %vm2798_vm13, %v3150_v49, %v3162_v38  ;;  %v1578_v33 = vsel %vm2798_vm13, %v3162_v38, %v3150_v49 }
0x13f0   :  { %v1342_v41 = vsel %vm2806_vm14, %v3152_v3, %v3172_v27  ;;  %v1579_v44 = vsel %vm2806_vm14, %v3172_v27, %v3152_v3 }
0x13f2   :  { %v1187_v46 = vpop.f32.mrb[40].mxu0 }
0x13f3   :  { %v3198_v48 = vadd.f32 %v1187_v46, %v1064_v53  ;;  %v1189_v50 = vpop.f32.mrb[41].mxu0 }
0x13f4   :  { %v3200_v19 = vadd.f32 %v1189_v50, %v1068_v31  ;;  %v1191_v61 = vpop.f32.mrb[42].mxu0 }
0x13f5   :  { %v3204_v17 = vadd.f32 %v1191_v61, %v1064_v53  ;;  %v1193_v58 = vpop.f32.mrb[43].mxu0  ;;  %v1218_v59 = vsel %vm2798_vm13, %v3146_v16, %v3198_v48  ;;  %v1657_v2 = vsel %vm2798_vm13, %v3198_v48, %v3146_v16 }
0x13f6   :  { %v3216_v21 = vadd.f32 %v1193_v58, %v1068_v31  ;;  %v1219_v63 = vsel %vm2806_vm14, %v3148_v25, %v3200_v19  ;;  %v1658_v1 = vsel %vm2806_vm14, %v3200_v19, %v3148_v25 }
0x13f7   :  { %v1196_v4 = vsel %vm2798_vm13, %v3202_v8, %v3204_v17  ;;  %v1736_v60 = vsel %vm2798_vm13, %v3204_v17, %v3202_v8 }
0x13f8   :  { %v1197_v9 = vsel %vm2806_vm14, %v3214_v13, %v3216_v21  ;;  %v1737_v10 = vsel %vm2806_vm14, %v3216_v21, %v3214_v13  ;;  %v2228_v62 = vmul.f32 -1.442695, %v1196_v4  ;;  %v2409_v21 = vld [vmem:[%s3542_s8 + $0x34] ss:$8 sps:$4 sm:$0xff]  }
0x13f9   :  { %2528 = vtanh.f32 %v1197_v9  ;;  %v2229_v53 = vmul.f32 -1.442695, %v1197_v9 }
0x13fa   :  { %2530 = vpow2.f32 %v2228_v62 }
0x13fb   :  { %2532 = vpow2.f32 %v2229_v53 }
0x1403   :  { %v2529_v40 = vpop.eup %2528 }
0x1404   :  { %1212 = vrot.lane.b32.xlu1 %v2529_v40, %s2626_s1  ;;  %v2531_v23 = vpop.eup %2530 }
0x1405   :  { %v1204_v31 = vadd.f32 1.0, %v2531_v23  ;;  %v2533_v7 = vpop.eup %2532 }
0x1406   :  { %v1205_v56 = vadd.f32 1.0, %v2533_v7 }
0x1407   :  { %2534 = vrcp.f32 %v1204_v31 }
0x1408   :  { %2536 = vrcp.f32 %v1205_v56 }
0x1411   :  { %v2535_v36 = vpop.eup %2534 }
0x1412   :  { %v2537_v51 = vpop.eup %2536 }
0x1476   :  { %v1213_v34 = vpop.permute.xlu1 %1212 }
0x1477   :  { %v1215_v12 = vmul.f32 %v2535_v36, %v1213_v34 }
0x1479   :  { %2538 = vtanh.f32 %v1215_v12  ;;  %1321 = vrot.lane.b32.xlu1 %v1215_v12, %s2626_s1 }
0x1483   :  { %v2539_v54 = vpop.eup %2538 }
0x1484   :  { %v1217_v30 = vmul.f32 %v2539_v54, %v2537_v51 }
0x1486   :  { %v3302_v14 = vpack.c.bf16 %v1217_v30, %v1217_v30 }
0x1488   :  { %2238 = vmatmul.mubr.msk.bf16.vlgmr.msra.gmra.mrb[24].mxu1 %vm462_vm0, %v3302_v14 }
0x1489   :  { %1348 = vmatpush1.bf16.msra.mxu1 %v3238_v5  ;;  %1379 = vmatprep.mubr.bf16.mxu1 %v2624_v0 }
0x148a   :  { %1349 = vmatprep.subr.bf16.mxu1 %v3258_v22 }
0x148d   :  { %1350 = vmatpush1.bf16.msra.mxu1 %v3263_v35 }
0x148e   :  { %1351 = vmatprep.subr.bf16.mxu1 %v3269_v24 }
0x1491   :  { %1352 = vmatpush1.bf16.msra.mxu1 %v3277_v26 }
0x1492   :  { %1353 = vmatprep.subr.bf16.mxu1 %v3284_v29 }
0x1495   :  { %1354 = vmatpush1.bf16.msra.mxu1 %v3291_v37 }
0x1496   :  { %1505 = vmatprep.subr.bf16.mxu1 %v3221_v18 }
0x14eb   :  { %v1322_v7 = vpop.permute.xlu1 %1321 }
0x155b   :  { %v1298_v57 = vpop.f32.mrb[24].mxu1 }
0x155c   :  { %v1305_v46 = vadd.f32 %v1298_v57, %v1218_v59  ;;  %v1300_v50 = vpop.f32.mrb[25].mxu1 }
0x155d   :  { %v1306_v61 = vadd.f32 %v1300_v50, %v1219_v63  ;;  %v1302_v58 = vpop.f32.mrb[26].mxu1 }
0x155e   :  { %v1303_v4 = vpop.f32.mrb[27].mxu1  ;;  %v2239_v40 = vmul.f32 -1.442695, %v1305_v46 }
0x155f   :  { %2540 = vtanh.f32 %v1306_v61  ;;  %v2240_v12 = vmul.f32 -1.442695, %v1306_v61 }
0x1560   :  { %2542 = vpow2.f32 %v2239_v40 }
0x1569   :  { %v2541_v9 = vpop.eup %2540 }
0x156a   :  { %1326 = vrot.lane.b32.xlu0 %v2541_v9, %s2626_s1  ;;  %v2543_v62 = vpop.eup %2542 }
0x156b   :  { %v1313_v53 = vadd.f32 1.0, %v2543_v62 }
0x156d   :  { %2544 = vrcp.f32 %v1313_v53 }
0x1577   :  { %v2545_v23 = vpop.eup %2544 }
0x1578   :  { %v1324_v56 = vmul.f32 %v2545_v23, %v1322_v7 }
0x15dc   :  { %v1327_v59 = vpop.permute.xlu0 %1326 }
0x15dd   :  { %v1329_v31 = vmul.f32 %v2545_v23, %v1327_v59 }
0x15df   :  { %1331 = vrot.lane.b32.xlu0 %v1329_v31, %s2626_s1 }
0x1651   :  { %v1332_v36 = vpop.permute.xlu0 %1331 }
0x1652   :  { %v1334_v63 = vadd.f32 %v1332_v36, %v1324_v56 }
0x1654   :  { %2546 = vtanh.f32 %v1334_v63 }
0x1655   :  { %2548 = vpow2.f32 %v2240_v12 }
0x165e   :  { %v2547_v34 = vpop.eup %2546 }
0x165f   :  { %1337 = vrot.lane.b32.xlu1 %v2547_v34, %s2626_s1  ;;  %v2549_v51 = vpop.eup %2548 }
0x1660   :  { %v1314_v54 = vadd.f32 1.0, %v2549_v51 }
0x1662   :  { %2550 = vrcp.f32 %v1314_v54 }
0x166c   :  { %v2551_v30 = vpop.eup %2550 }
0x16d1   :  { %v1338_v57 = vpop.permute.xlu1 %1337 }
0x16d2   :  { %v1340_v46 = vmul.f32 %v2551_v30, %v1338_v57 }
0x16d4   :  { %v1343_v50 = vpack.c.bf16 %v1340_v46, %v1340_v46 }
0x16d6   :  { %2241 = vmatmul.mubr.msk.bf16.vlgmr.msra.gmra.mrb[28].mxu1 %vm462_vm0, %v1343_v50 }
0x16d7   :  { %1506 = vmatpush1.bf16.msra.mxu1 %v3238_v5  ;;  %1537 = vmatprep.mubr.bf16.mxu1 %v2624_v0 }
0x16d8   :  { %1507 = vmatprep.subr.bf16.mxu1 %v3258_v22 }
0x16db   :  { %1508 = vmatpush1.bf16.msra.mxu1 %v3263_v35 }
0x16dc   :  { %1509 = vmatprep.subr.bf16.mxu1 %v3269_v24 }
0x16df   :  { %1510 = vmatpush1.bf16.msra.mxu1 %v3277_v26 }
0x16e0   :  { %1511 = vmatprep.subr.bf16.mxu1 %v3284_v29 }
0x16e3   :  { %1512 = vmatpush1.bf16.msra.mxu1 %v3291_v37 }
0x16e4   :  { %1663 = vmatprep.subr.bf16.mxu1 %v3221_v18 }
0x17a9   :  { %v1381_v61 = vpop.f32.mrb[28].mxu1 }
0x17aa   :  { %v1388_v58 = vadd.f32 %v1381_v61, %v1341_v32  ;;  %v1383_v4 = vpop.f32.mrb[29].mxu1 }
0x17ab   :  { %v1389_v9 = vadd.f32 %v1383_v4, %v1342_v41  ;;  %v1385_v40 = vpop.f32.mrb[30].mxu1 }
0x17ac   :  { %v1386_v62 = vpop.f32.mrb[31].mxu1  ;;  %v2242_v23 = vmul.f32 -1.442695, %v1388_v58 }
0x17ad   :  { %2552 = vtanh.f32 %v1389_v9  ;;  %v2243_v51 = vmul.f32 -1.442695, %v1389_v9 }
0x17ae   :  { %2554 = vpow2.f32 %v2242_v23 }
0x17b7   :  { %v2553_v53 = vpop.eup %2552 }
0x17b8   :  { %1405 = vrot.lane.b32.xlu0 %v2553_v53, %s2626_s1  ;;  %v2555_v59 = vpop.eup %2554 }
0x17b9   :  { %v1396_v31 = vadd.f32 1.0, %v2555_v59 }
0x17bb   :  { %2556 = vrcp.f32 %v1396_v31 }
0x17c5   :  { %v2557_v7 = vpop.eup %2556 }
0x17c6   :  { %v1403_v36 = vmul.f32 %v2557_v7, %v1334_v63 }
0x182a   :  { %v1406_v32 = vpop.permute.xlu0 %1405 }
0x182b   :  { %v1408_v56 = vmul.f32 %v2557_v7, %v1406_v32 }
0x182d   :  { %1410 = vrot.lane.b32.xlu1 %v1408_v56, %s2626_s1 }
0x189f   :  { %v1411_v34 = vpop.permute.xlu1 %1410 }
0x18a0   :  { %v1413_v12 = vadd.f32 %v1411_v34, %v1403_v36 }
0x18a2   :  { %2558 = vtanh.f32 %v1413_v12 }
0x18a3   :  { %2560 = vpow2.f32 %v2243_v51 }
0x18ac   :  { %v2559_v41 = vpop.eup %2558 }
0x18ad   :  { %1416 = vrot.lane.b32.xlu0 %v2559_v41, %s2626_s1  ;;  %v2561_v54 = vpop.eup %2560 }
0x18ae   :  { %v1397_v30 = vadd.f32 1.0, %v2561_v54 }
0x18b0   :  { %2562 = vrcp.f32 %v1397_v30 }
0x18ba   :  { %v2563_v57 = vpop.eup %2562 }
0x191f   :  { %v1417_v46 = vpop.permute.xlu0 %1416 }
0x1920   :  { %v1419_v50 = vmul.f32 %v2563_v57, %v1417_v46 }
0x1922   :  { %v1422_v61 = vpack.c.bf16 %v1419_v50, %v1419_v50 }
0x1924   :  { %2244 = vmatmul.mubr.msk.bf16.vlgmr.msra.gmra.mrb[44].mxu0 %vm462_vm0, %v1422_v61 }
0x1925   :  { %1585 = vmatpush1.bf16.msra.mxu0 %v3238_v5  ;;  %1616 = vmatprep.mubr.bf16.mxu0 %v2624_v0 }
0x1926   :  { %1586 = vmatprep.subr.bf16.mxu0 %v3258_v22 }
0x1929   :  { %1587 = vmatpush1.bf16.msra.mxu0 %v3263_v35 }
0x192a   :  { %1588 = vmatprep.subr.bf16.mxu0 %v3269_v24 }
0x192d   :  { %1589 = vmatpush1.bf16.msra.mxu0 %v3277_v26 }
0x192e   :  { %1590 = vmatprep.subr.bf16.mxu0 %v3284_v29 }
0x1931   :  { %1591 = vmatpush1.bf16.msra.mxu0 %v3291_v37 }
0x1932   :  { %1742 = vmatprep.subr.bf16.mxu0 %v3221_v18 }
0x19f7   :  { %v1460_v63 = vpop.f32.mrb[44].mxu0 }
0x19f8   :  { %v1467_v58 = vadd.f32 %v1460_v63, %v1420_v42  ;;  %v1462_v4 = vpop.f32.mrb[45].mxu0 }
0x19f9   :  { %v1468_v9 = vadd.f32 %v1462_v4, %v1421_v28  ;;  %v1464_v40 = vpop.f32.mrb[46].mxu0 }
0x19fa   :  { %v1465_v62 = vpop.f32.mrb[47].mxu0  ;;  %v2245_v18 = vmul.f32 -1.442695, %v1467_v58 }
0x19fb   :  { %2564 = vtanh.f32 %v1468_v9  ;;  %v2246_v34 = vmul.f32 -1.442695, %v1468_v9 }
0x19fc   :  { %2566 = vpow2.f32 %v2245_v18 }
0x1a05   :  { %v2565_v53 = vpop.eup %2564 }
0x1a06   :  { %1484 = vrot.lane.b32.xlu1 %v2565_v53, %s2626_s1  ;;  %v2567_v23 = vpop.eup %2566 }
0x1a07   :  { %v1475_v59 = vadd.f32 1.0, %v2567_v23 }
0x1a09   :  { %2568 = vrcp.f32 %v1475_v59 }
0x1a13   :  { %v2569_v31 = vpop.eup %2568 }
0x1a14   :  { %v1482_v32 = vmul.f32 %v2569_v31, %v1413_v12 }
0x1a78   :  { %v1485_v42 = vpop.permute.xlu1 %1484 }
0x1a79   :  { %v1487_v7 = vmul.f32 %v2569_v31, %v1485_v42 }
0x1a7b   :  { %1489 = vrot.lane.b32.xlu0 %v1487_v7, %s2626_s1 }
0x1aed   :  { %v1490_v56 = vpop.permute.xlu0 %1489 }
0x1aee   :  { %v1492_v36 = vadd.f32 %v1490_v56, %v1482_v32 }
0x1af0   :  { %2570 = vtanh.f32 %v1492_v36 }
0x1af1   :  { %2572 = vpow2.f32 %v2246_v34 }
0x1afa   :  { %v2571_v28 = vpop.eup %2570 }
0x1afb   :  { %1495 = vrot.lane.b32.xlu1 %v2571_v28, %s2626_s1  ;;  %v2573_v41 = vpop.eup %2572 }
0x1afc   :  { %v1476_v51 = vadd.f32 1.0, %v2573_v41 }
0x1afe   :  { %2574 = vrcp.f32 %v1476_v51 }
0x1b08   :  { %v2575_v54 = vpop.eup %2574 }
0x1b6d   :  { %v1496_v30 = vpop.permute.xlu1 %1495 }
0x1b6e   :  { %v1498_v57 = vmul.f32 %v2575_v54, %v1496_v30 }
0x1b70   :  { %v1501_v46 = vpack.c.bf16 %v1498_v57, %v1498_v57 }
0x1b72   :  { %2247 = vmatmul.mubr.msk.bf16.vlgmr.msra.gmra.mrb[32].mxu1 %vm462_vm0, %v1501_v46 }
0x1b73   :  { %1664 = vmatpush1.bf16.msra.mxu1 %v3238_v5  ;;  %1695 = vmatprep.mubr.bf16.mxu1 %v2624_v0 }
0x1b74   :  { %1665 = vmatprep.subr.bf16.mxu1 %v3258_v22 }
0x1b77   :  { %1666 = vmatpush1.bf16.msra.mxu1 %v3263_v35 }
0x1b78   :  { %1667 = vmatprep.subr.bf16.mxu1 %v3269_v24 }
0x1b7b   :  { %1668 = vmatpush1.bf16.msra.mxu1 %v3277_v26 }
0x1b7c   :  { %1669 = vmatprep.subr.bf16.mxu1 %v3284_v29 }
0x1b7f   :  { %1670 = vmatpush1.bf16.msra.mxu1 %v3291_v37 }
0x1b80   :  { %1850 = vmatprep.subr.bf16.mxu1 %v2406_v6 }
0x1c45   :  { %v1539_v12 = vpop.f32.mrb[32].mxu1 }
0x1c46   :  { %v1546_v50 = vadd.f32 %v1539_v12, %v1499_v43  ;;  %v1541_v61 = vpop.f32.mrb[33].mxu1 }
0x1c47   :  { %v1547_v63 = vadd.f32 %v1541_v61, %v1500_v39  ;;  %v1543_v58 = vpop.f32.mrb[34].mxu1 }
0x1c48   :  { %v1544_v4 = vpop.f32.mrb[35].mxu1  ;;  %v2248_v40 = vmul.f32 -1.442695, %v1546_v50 }
0x1c49   :  { %2576 = vtanh.f32 %v1547_v63  ;;  %v2249_v39 = vmul.f32 -1.442695, %v1547_v63 }
0x1c4a   :  { %2578 = vpow2.f32 %v2248_v40 }
0x1c53   :  { %v2577_v9 = vpop.eup %2576 }
0x1c54   :  { %1563 = vrot.lane.b32.xlu0 %v2577_v9, %s2626_s1  ;;  %v2579_v62 = vpop.eup %2578 }
0x1c55   :  { %v1554_v53 = vadd.f32 1.0, %v2579_v62 }
0x1c57   :  { %2580 = vrcp.f32 %v1554_v53 }
0x1c61   :  { %v2581_v20 = vpop.eup %2580 }
0x1c62   :  { %v1561_v18 = vmul.f32 %v2581_v20, %v1492_v36 }
0x1cc6   :  { %v1564_v15 = vpop.permute.xlu0 %1563 }
0x1cc7   :  { %v1566_v43 = vmul.f32 %v2581_v20, %v1564_v15 }
0x1cc9   :  { %1568 = vrot.lane.b32.xlu1 %v1566_v43, %s2626_s1 }
0x1d3b   :  { %v1569_v23 = vpop.permute.xlu1 %1568 }
0x1d3c   :  { %v1571_v52 = vadd.f32 %v1569_v23, %v1561_v18 }
0x1d3e   :  { %2582 = vtanh.f32 %v1571_v52 }
0x1d3f   :  { %2584 = vpow2.f32 %v2249_v39 }
0x1d48   :  { %v2583_v55 = vpop.eup %2582 }
0x1d49   :  { %1574 = vrot.lane.b32.xlu0 %v2583_v55, %s2626_s1  ;;  %v2585_v59 = vpop.eup %2584 }
0x1d4a   :  { %v1555_v31 = vadd.f32 1.0, %v2585_v59 }
0x1d4c   :  { %2586 = vrcp.f32 %v1555_v31 }
0x1d56   :  { %v2587_v42 = vpop.eup %2586 }
0x1dbb   :  { %v1575_v7 = vpop.permute.xlu0 %1574 }
0x1dbc   :  { %v1577_v32 = vmul.f32 %v2587_v42, %v1575_v7 }
0x1dbe   :  { %v1580_v56 = vpack.c.bf16 %v1577_v32, %v1577_v32 }
0x1dc0   :  { %2250 = vmatmul.mubr.msk.bf16.vlgmr.msra.gmra.mrb[48].mxu0 %vm462_vm0, %v1580_v56 }
0x1dc1   :  { %1743 = vmatpush1.bf16.msra.mxu0 %v3238_v5  ;;  %1774 = vmatprep.mubr.bf16.mxu0 %v2624_v0 }
0x1dc2   :  { %1744 = vmatprep.subr.bf16.mxu0 %v3258_v22 }
0x1dc5   :  { %1745 = vmatpush1.bf16.msra.mxu0 %v3263_v35 }
0x1dc6   :  { %1746 = vmatprep.subr.bf16.mxu0 %v3269_v24 }
0x1dc9   :  { %1747 = vmatpush1.bf16.msra.mxu0 %v3277_v26 }
0x1dca   :  { %1748 = vmatprep.subr.bf16.mxu0 %v3284_v29 }
0x1dcd   :  { %1749 = vmatpush1.bf16.msra.mxu0 %v3291_v37 }
0x1e93   :  { %v1618_v36 = vpop.f32.mrb[48].mxu0 }
0x1e94   :  { %v1625_v5 = vadd.f32 %v1618_v36, %v1578_v33  ;;  %v1620_v28 = vpop.f32.mrb[49].mxu0 }
0x1e95   :  { %v1626_v22 = vadd.f32 %v1620_v28, %v1579_v44  ;;  %v1622_v35 = vpop.f32.mrb[50].mxu0 }
0x1e96   :  { %v1623_v24 = vpop.f32.mrb[51].mxu0  ;;  %v2251_v29 = vmul.f32 -1.442695, %v1625_v5  ;;  %v2410_v35 = vld [vmem:[%s3542_s8] ss:$8 sps:$4 sm:$0xff]  }
0x1e97   :  { %2588 = vtanh.f32 %v1626_v22  ;;  %v2252_v44 = vmul.f32 -1.442695, %v1626_v22  ;;  %v2412_v24 = vld [vmem:[%s3542_s8 + $0x4] ss:$8 sps:$4 sm:$0xff]  }
0x1e98   :  { %2590 = vpow2.f32 %v2251_v29  ;;  %1914 = vmatprep.subr.bf16.mxu0 %v2412_v24  ;;  %v2413_v29 = vld [vmem:[%s3542_s8 + $0x10] ss:$8 sps:$4 sm:$0xff]  }
0x1ea1   :  { %v2589_v26 = vpop.eup %2588 }
0x1ea2   :  { %1642 = vrot.lane.b32.xlu1 %v2589_v26, %s2626_s1  ;;  %v2591_v37 = vpop.eup %2590  ;;  %v2415_v26 = vld [vmem:[%s3542_s8 + $0x14] ss:$8 sps:$4 sm:$0xff]  }
0x1ea3   :  { %v1633_v34 = vadd.f32 1.0, %v2591_v37 }
0x1ea5   :  { %2592 = vrcp.f32 %v1633_v34 }
0x1eaf   :  { %v2593_v49 = vpop.eup %2592 }
0x1eb0   :  { %v1640_v41 = vmul.f32 %v2593_v49, %v1571_v52 }
0x1f14   :  { %v1643_v38 = vpop.permute.xlu1 %1642 }
0x1f15   :  { %v1645_v33 = vmul.f32 %v2593_v49, %v1643_v38 }
0x1f17   :  { %1647 = vrot.lane.b32.xlu0 %v1645_v33, %s2626_s1 }
0x1f89   :  { %v1648_v51 = vpop.permute.xlu0 %1647 }
0x1f8a   :  { %v1650_v3 = vadd.f32 %v1648_v51, %v1640_v41  ;;  %v2416_v41 = vld [vmem:[%s3543_s10 + $0x40] sm:$0xff]   ;;  %v2418_v51 = vld [vmem:[%s3543_s10 + $0x48] sm:$0xff]  }
0x1f8c   :  { %2594 = vtanh.f32 %v1650_v3 }
0x1f8d   :  { %2596 = vpow2.f32 %v2252_v44 }
0x1f96   :  { %v2595_v27 = vpop.eup %2594 }
0x1f97   :  { %1653 = vrot.lane.b32.xlu1 %v2595_v27, %s2626_s1  ;;  %v2597_v54 = vpop.eup %2596  ;;  %v2420_v27 = vld [vmem:[%s3543_s10 + $0x50] sm:$0xff]  }
0x1f98   :  { %v1634_v30 = vadd.f32 1.0, %v2597_v54  ;;  %v2421_v54 = vld [vmem:[%s3543_s10 + $0x10] sm:$0xff]  }
0x1f9a   :  { %2598 = vrcp.f32 %v1634_v30  ;;  %v2422_v30 = vld [vmem:[%s3543_s10 + $0x58] sm:$0xff]  }
0x1fa4   :  { %v2599_v57 = vpop.eup %2598 }
0x2009   :  { %v1654_v46 = vpop.permute.xlu1 %1653 }
0x200a   :  { %v1656_v12 = vmul.f32 %v2599_v57, %v1654_v46  ;;  %v2423_v57 = vld [vmem:[%s3543_s10 + $0x18] sm:$0xff]   ;;  %v2424_v46 = vld [vmem:[%s3543_s10 + $0x60] sm:$0xff]  }
0x200c   :  { %v1659_v50 = vpack.c.bf16 %v1656_v12, %v1656_v12  ;;  %v2425_v12 = vld [vmem:[%s3543_s10 + $0x20] sm:$0xff]  }
0x200e   :  { %2253 = vmatmul.mubr.msk.bf16.vlgmr.msra.gmra.mrb[36].mxu1 %vm462_vm0, %v1659_v50  ;;  %v2426_v50 = vld [vmem:[%s3543_s10 + $0x68] sm:$0xff]  }
0x200f   :  { %1882 = vmatprep.mubr.bf16.mxu1 %v2624_v0 }
0x20e1   :  { %v1697_v61 = vpop.f32.mrb[36].mxu1 }
0x20e2   :  { %v1704_v63 = vadd.f32 %v1697_v61, %v1657_v2  ;;  %v1699_v58 = vpop.f32.mrb[37].mxu1 }
0x20e3   :  { %v1705_v4 = vadd.f32 %v1699_v58, %v1658_v1  ;;  %v1701_v9 = vpop.f32.mrb[38].mxu1 }
0x20e4   :  { %v1702_v40 = vpop.f32.mrb[39].mxu1  ;;  %v2254_v53 = vmul.f32 -1.442695, %v1704_v63 }
0x20e5   :  { %2600 = vtanh.f32 %v1705_v4  ;;  %v2255_v1 = vmul.f32 -1.442695, %v1705_v4 }
0x20e6   :  { %2602 = vpow2.f32 %v2254_v53 }
0x20ef   :  { %v2601_v62 = vpop.eup %2600 }
0x20f0   :  { %1721 = vrot.lane.b32.xlu0 %v2601_v62, %s2626_s1  ;;  %v2603_v20 = vpop.eup %2602  ;;  %v2427_v62 = vld [vmem:[%s3543_s10 + $0x28] sm:$0xff]  }
0x20f1   :  { %v1712_v15 = vadd.f32 1.0, %v2603_v20 }
0x20f3   :  { %2604 = vrcp.f32 %v1712_v15  ;;  %v2428_v15 = vld [vmem:[%s3543_s10 + $0x70] sm:$0xff]  }
0x20fd   :  { %v2605_v16 = vpop.eup %2604 }
0x20fe   :  { %v1719_v43 = vmul.f32 %v2605_v16, %v1650_v3  ;;  %v2419_v3 = vld [vmem:[%s3543_s10 + $0x8] sm:$0xff]  }
0x2162   :  { %v1722_v48 = vpop.permute.xlu0 %1721 }
0x2163   :  { %v1724_v2 = vmul.f32 %v2605_v16, %v1722_v48  ;;  %v2429_v48 = vld [vmem:[%s3543_s10 + $0x30] sm:$0xff]  }
0x2165   :  { %1726 = vrot.lane.b32.xlu1 %v1724_v2, %s2626_s1 }
0x21d7   :  { %v1727_v18 = vpop.permute.xlu1 %1726 }
0x21d8   :  { %v1729_v25 = vadd.f32 %v1727_v18, %v1719_v43  ;;  %v2430_v43 = vld [vmem:[%s3543_s10 + $0x78] sm:$0xff]  }
0x21d9   :  { %v2431_v18 = vld [vmem:[%s3543_s10 + $0x38] sm:$0xff]  }
0x21da   :  { %2606 = vtanh.f32 %v1729_v25 }
0x21db   :  { %2608 = vpow2.f32 %v2255_v1 }
0x21e4   :  { %v2607_v19 = vpop.eup %2606 }
0x21e5   :  { %1732 = vrot.lane.b32.xlu0 %v2607_v19, %s2626_s1  ;;  %v2609_v23 = vpop.eup %2608 }
0x21e6   :  { %v1713_v52 = vadd.f32 1.0, %v2609_v23 }
0x21e8   :  { %2610 = vrcp.f32 %v1713_v52 }
0x21f2   :  { %v2611_v55 = vpop.eup %2610 }
0x2257   :  { %v1733_v39 = vpop.permute.xlu0 %1732 }
0x2258   :  { %v1735_v59 = vmul.f32 %v2611_v55, %v1733_v39 }
0x225a   :  { %v1738_v31 = vpack.c.bf16 %v1735_v59, %v1735_v59 }
0x225c   :  { %2256 = vmatmul.mubr.msk.bf16.vlgmr.msra.gmra.mrb[52].mxu0 %vm462_vm0, %v1738_v31 }
0x225d   :  { %1946 = vmatprep.mubr.bf16.mxu0 %v2624_v0  ;;  %v2404_v0 = vld [vmem:[%s3542_s8 + $0x20] ss:$8 sps:$4 sm:$0xff]   ;;  %1915 = vmatpush1.bf16.msra.mxu0 %v2410_v35 }
0x225e   :  { %1851 = vmatpush1.bf16.msra.mxu1 %v2404_v0  ;;  %1916 = vmatprep.subr.bf16.mxu0 %v2415_v26 }
0x225f   :  { %1852 = vmatprep.subr.bf16.mxu1 %v2409_v21 }
0x2261   :  { %1917 = vmatpush1.bf16.msra.mxu0 %v2413_v29 }
0x232f   :  { %v1776_v42 = vpop.f32.mrb[52].mxu0 }
0x2330   :  { %v1783_v7 = vadd.f32 %v1776_v42, %v1736_v60  ;;  %v1778_v32 = vpop.f32.mrb[53].mxu0  ;;  %v2407_v60 = vld [vmem:[%s3542_s8 + $0x30] ss:$8 sps:$4 sm:$0xff]  }
0x2331   :  { %v1784_v56 = vadd.f32 %v1778_v32, %v1737_v10  ;;  %v1780_v36 = vpop.f32.mrb[54].mxu0  ;;  %1853 = vmatpush1.bf16.msra.mxu1 %v2407_v60 }
0x2332   :  { %v1781_v5 = vpop.f32.mrb[55].mxu0  ;;  %v2257_v11 = vmul.f32 -1.442695, %v1783_v7  ;;  %2298 = vmatprep.subr.bf16.mxu1 %v2416_v41 }
0x2333   :  { %2612 = vtanh.f32 %v1784_v56  ;;  %v2258_v44 = vmul.f32 -1.442695, %v1784_v56 }
0x2334   :  { %2614 = vpow2.f32 %v2257_v11 }
0x233d   :  { %v2613_v8 = vpop.eup %2612 }
0x233e   :  { %1800 = vrot.lane.b32.xlu1 %v2613_v8, %s2626_s1  ;;  %v2615_v17 = vpop.eup %2614 }
0x233f   :  { %v1791_v13 = vadd.f32 1.0, %v2615_v17 }
0x2341   :  { %2616 = vrcp.f32 %v1791_v13 }
0x234b   :  { %v2617_v10 = vpop.eup %2616 }
0x234c   :  { %v1798_v37 = vmul.f32 %v2617_v10, %v1729_v25  ;;  %v1955_v25 = vld [vmem:[%s3544_s9] sm:$0x3] }
0x234d   :  { %v1960_v19 = vrot.slane %v1955_v25, %v2775_v45  ;;  %v1964_v23 = vrot.slane %v1955_v25, %v2780_v47  ;;  %v2269_v45 = vld [vmem:[%s3545_s11] ss:$0 sm:$0xff] }
0x23b0   :  { %v1801_v28 = vpop.permute.xlu1 %1800 }
0x23b1   :  { %v1803_v22 = vmul.f32 %v2617_v10, %v1801_v28 }
0x23b3   :  { %1805 = vrot.lane.b32.xlu0 %v1803_v22, %s2626_s1 }
0x23b7   :  { %1825 = vrot.lane.b32.xlu0 %v3302_v14, %s2627_s20  ;;  %v2417_v14 = vld [vmem:[%s3543_s10] sm:$0xff]  }
0x2425   :  { %v1806_v34 = vpop.permute.xlu0 %1805 }
0x2426   :  { %v1808_v49 = vadd.f32 %v1806_v34, %v1798_v37 }
0x2428   :  { %2618 = vtanh.f32 %v1808_v49 }
0x2429   :  { %v1826_v38 = vpop.permute.xlu0 %1825  ;;  %2620 = vpow2.f32 %v2258_v44 }
0x242a   :  { %2263 = vmatmul.mubr.msk.bf16.vlgmr.msra.gmra.mrb[40].mxu1 %vm308_vm12, %v1826_v38 }
0x242b   :  { %2299 = vmatpush3.bf16.msra.mxu1 %v2417_v14 }
0x242c   :  { %2300 = vmatprep.subr.bf16.mxu1 %v2418_v51 }
0x242f   :  { %2301 = vmatpush3.bf16.msra.mxu1 %v2419_v3 }
0x2430   :  { %2302 = vmatprep.subr.bf16.mxu1 %v2420_v27 }
0x2432   :  { %v2619_v33 = vpop.eup %2618 }
0x2433   :  { %1811 = vrot.lane.b32.xlu1 %v2619_v33, %s2626_s1  ;;  %2303 = vmatpush3.bf16.msra.mxu1 %v2421_v54  ;;  %v2621_v61 = vpop.eup %2620 }
0x2434   :  { %2304 = vmatprep.subr.bf16.mxu1 %v2422_v30  ;;  %v1792_v63 = vadd.f32 1.0, %v2621_v61 }
0x2436   :  { %2622 = vrcp.f32 %v1792_v63 }
0x2437   :  { %2305 = vmatpush3.bf16.msra.mxu1 %v2423_v57 }
0x2438   :  { %2306 = vmatprep.subr.bf16.mxu1 %v2424_v46 }
0x243b   :  { %2307 = vmatpush3.bf16.msra.mxu1 %v2425_v12 }
0x243c   :  { %2308 = vmatprep.subr.bf16.mxu1 %v2426_v50 }
0x243f   :  { %2309 = vmatpush3.bf16.msra.mxu1 %v2427_v62 }
0x2440   :  { %v2623_v58 = vpop.eup %2622  ;;  %2310 = vmatprep.subr.bf16.mxu1 %v2428_v15 }
0x2443   :  { %2311 = vmatpush3.bf16.msra.mxu1 %v2429_v48 }
0x2444   :  { %2312 = vmatprep.subr.bf16.mxu1 %v2430_v43 }
0x2447   :  { %2313 = vmatpush3.bf16.msra.mxu1 %v2431_v18 }
0x24a5   :  { %v1812_v4 = vpop.permute.xlu1 %1811 }
0x24a6   :  { %v1814_v9 = vmul.f32 %v2623_v58, %v1812_v4 }
0x24a8   :  { %v1815_v40 = vpack.c.bf16 %v1814_v9, %v1814_v9 }
0x24aa   :  { %2268 = vmatmul.mubr.msk.bf16.vlgmr.msra.gmra.mrb[56].mxu0 %vm308_vm12, %v1815_v40 }
0x24fd   :  { %v1884_v53 = vpop.f32.mrb[40].mxu1 }
0x24fe   :  { %v1886_v20 = vpop.f32.mrb[41].mxu1 }
0x24ff   :  { %v1888_v16 = vpop.f32.mrb[42].mxu1 }
0x2500   :  { %v1889_v2 = vpop.f32.mrb[43].mxu1 }
0x257d   :  { %v1948_v1 = vpop.f32.mrb[56].mxu0 }
0x257e   :  { %v1949_v52 = vadd.f32 %v1948_v1, %v1884_v53  ;;  %v1950_v55 = vpop.f32.mrb[57].mxu0 }
0x257f   :  { %v1951_v39 = vadd.f32 %v1950_v55, %v1886_v20  ;;  %v1952_v59 = vpop.f32.mrb[58].mxu0 }
0x2580   :  { %v1967_v31 = vadd.f32 %v1960_v19, %v1949_v52  ;;  %v1953_v42 = vpop.f32.mrb[59].mxu0 }
0x2581   :  { %v1968_v7 = vadd.f32 %v1964_v23, %v1951_v39 }
0x2582   :  { %v1969_v32 = vmax.f32 %v1967_v31, 0.0 }
0x2583   :  { %v1970_v56 = vmax.f32 %v1968_v7, 0.0 }
0x2584   :  { %v1971_v5 = vpack.c.bf16 %v1969_v32, %v1969_v32 }
0x2585   :  { %v1972_v36 = vpack.c.bf16 %v1970_v56, %v1970_v56 }
0x2587   :  { %2140 = vmatprep.mubr.bf16.mxu1 %v1972_v36 }
0x2588   :  { %2141 = vmatmul.mubr.bf16.vlgmr.msra.gmra.mrb[44].mxu1 %v1971_v5 }
0x265b   :  { %v2314_v0 = vpop.f32.mrb[44].mxu1 }
0x265c   :  { %v2315_v6 = vpop.f32.mrb[45].mxu1 }
0x265d   :  { %v2316_v47 = vadd.f32 %v2315_v6, %v2314_v0  ;;  %v2317_v8 = vpop.f32.mrb[46].mxu1 }
0x265e   :  { %v2318_v11 = vpop.f32.mrb[47].mxu1 }
0x265f   :  { %v2143_v17 = vadd.f32 %v2316_v47, %v2269_v45 }
0x2661   :  { %2148 = vst [vmem:[%s3546_s12] sm:$0xff] %v2143_v17 }

</bundles_post_ra>
